<compile_context>
chip_gen: v6e
topology: v6e:2x2x1
jax: 0.10.0
libtpu: 0.0.40
codegen_flags: <defaults>
</compile_context>

<pallas_src>
import functools

import jax
import jax.numpy as jnp
from jax import lax
from jax.experimental import pallas as pl
from jax.experimental.pallas import tpu as pltpu

_VMEM_LIMIT = 48 * 1024 * 1024  # headroom below v7x's 64 MiB physical VMEM


# ----------------------------------------------------------------------------
# Kernel 1: batched per-timestep input projection (generic; weights pre-concatenated
#           along the output dim), hoisted out of the serial recurrence.
# ----------------------------------------------------------------------------
def _proj_kernel(*refs, n_in):
    """out[t] = sum_i x_i[t] @ W_i + b.

    refs = (x_1..x_n, W_1..W_n, b, out)
      x_i: (1, B, F_i) bf16 block (one timestep)
      W_i: (F_i, Hout) bf16, resident
      b:   (1, Hout)   f32  (b_ih + b_hh folded)
      out: (1, B, Hout) f32
    """
    xs = refs[:n_in]
    ws = refs[n_in:2 * n_in]
    b = refs[2 * n_in]
    out = refs[2 * n_in + 1]

    acc = b[...]  # (1, Hout) -> broadcasts to (B, Hout)
    for x, w in zip(xs, ws):
        acc = acc + jnp.dot(x[0], w[...], preferred_element_type=jnp.float32)
    out[0] = acc


def _input_projection(xs, ws, b):
    """xs: list of (T, B, F_i) bf16 arrays; ws: list of (F_i, Hout) -> (T, B, Hout) f32."""
    n = len(xs)
    T, B, _ = xs[0].shape
    Hout = ws[0].shape[1]

    x_specs = [pl.BlockSpec((1, B, int(x.shape[2])), lambda t: (t, 0, 0)) for x in xs]
    w_specs = [pl.BlockSpec(w.shape, lambda t: (0, 0)) for w in ws]
    b_spec = pl.BlockSpec((1, Hout), lambda t: (0, 0))
    out_spec = pl.BlockSpec((1, B, Hout), lambda t: (t, 0, 0))

    return pl.pallas_call(
        functools.partial(_proj_kernel, n_in=n),
        out_shape=jax.ShapeDtypeStruct((T, B, Hout), jnp.float32),
        grid=(T,),
        in_specs=x_specs + w_specs + [b_spec],
        out_specs=out_spec,
        compiler_params=pltpu.CompilerParams(
            dimension_semantics=("parallel",),
            vmem_limit_bytes=_VMEM_LIMIT),
    )(*xs, *ws, b)


# ----------------------------------------------------------------------------
# Kernel 2: layer-0 fused bidirectional ReLU recurrence, full-sequence outputs.
# ----------------------------------------------------------------------------
def _rnn_seq_kernel(pre_f_ref, pre_b_ref, whh_f_ref, whh_b_ref,
                    out_f_ref, out_b_ref, hf_sc, hb_sc):
    @pl.when(pl.program_id(0) == 0)
    def _():
        hf_sc[...] = jnp.zeros_like(hf_sc)
        hb_sc[...] = jnp.zeros_like(hb_sc)

    hf = jnp.maximum(
        pre_f_ref[0] + jnp.dot(hf_sc[...].astype(jnp.bfloat16), whh_f_ref[...],
                               preferred_element_type=jnp.float32), 0.0)
    hb = jnp.maximum(
        pre_b_ref[0] + jnp.dot(hb_sc[...].astype(jnp.bfloat16), whh_b_ref[...],
                               preferred_element_type=jnp.float32), 0.0)
    hf_sc[...] = hf
    hb_sc[...] = hb
    out_f_ref[0] = hf.astype(out_f_ref.dtype)
    out_b_ref[0] = hb.astype(out_b_ref.dtype)


def _rnn_layer0(pre0, whh_f, whh_b):
    """pre0: (T, B, 2H) f32 (fwd half | bwd half) -> (out_f, out_b) each (T, B, H) bf16."""
    T, B, H2 = pre0.shape
    H = H2 // 2
    return pl.pallas_call(
        _rnn_seq_kernel,
        out_shape=(jax.ShapeDtypeStruct((T, B, H), jnp.bfloat16),
                   jax.ShapeDtypeStruct((T, B, H), jnp.bfloat16)),
        grid=(T,),
        in_specs=[
            pl.BlockSpec((1, B, H), lambda s: (s, 0, 0)),            # fwd pre-act at t=s
            pl.BlockSpec((1, B, H), lambda s: (T - 1 - s, 0, 1)),    # bwd pre-act at t=T-1-s
            pl.BlockSpec((H, H), lambda s: (0, 0)),                  # W_hh fwd (resident)
            pl.BlockSpec((H, H), lambda s: (0, 0)),                  # W_hh bwd (resident)
        ],
        out_specs=(
            pl.BlockSpec((1, B, H), lambda s: (s, 0, 0)),            # fwd hidden at t=s
            pl.BlockSpec((1, B, H), lambda s: (T - 1 - s, 0, 0)),    # bwd hidden at t=T-1-s
        ),
        scratch_shapes=[pltpu.VMEM((B, H), jnp.float32),
                        pltpu.VMEM((B, H), jnp.float32)],
        compiler_params=pltpu.CompilerParams(
            dimension_semantics=("arbitrary",),
            vmem_limit_bytes=_VMEM_LIMIT),
    )(pre0, pre0, whh_f, whh_b)


# ----------------------------------------------------------------------------
# Kernel 3: layer-1 forward recurrence + single backward step + fused mean/std heads,
#           emitting ONLY the quantities derived from output[:, -1].
# ----------------------------------------------------------------------------
def _rnn_last_head_kernel(pre_f_ref, h0f_last_ref, h0b_last_ref,
                          w1b_f_ref, w1b_b_ref, b1b_ref,
                          whh_f_ref,
                          wm_f_ref, wm_b_ref, bm_ref,
                          wv_f_ref, wv_b_ref, bv_ref,
                          mean_ref, std_ref,
                          hf_sc, m_sc, v_sc, *, min_std):
    s = pl.program_id(0)
    T = pl.num_programs(0)

    @pl.when(s == 0)
    def _():
        hf_sc[...] = jnp.zeros_like(hf_sc)
        # layer-1 backward direction: only its FIRST reversed step (t = T-1) contributes to
        # output[:, -1]; with h_init = 0 there is no recurrent matmul.
        hb = jnp.maximum(
            jnp.dot(h0f_last_ref[0], w1b_f_ref[...], preferred_element_type=jnp.float32)
            + jnp.dot(h0b_last_ref[0], w1b_b_ref[...], preferred_element_type=jnp.float32)
            + b1b_ref[...], 0.0).astype(jnp.bfloat16)
        m_sc[...] = jnp.dot(hb, wm_b_ref[...], preferred_element_type=jnp.float32) + bm_ref[...]
        v_sc[...] = jnp.dot(hb, wv_b_ref[...], preferred_element_type=jnp.float32) + bv_ref[...]

    hf = jnp.maximum(
        pre_f_ref[0] + jnp.dot(hf_sc[...].astype(jnp.bfloat16), whh_f_ref[...],
                               preferred_element_type=jnp.float32), 0.0)
    hf_sc[...] = hf

    # fwd half of output[:, -1] = fwd final hidden at t = T-1; finalize the heads here.
    @pl.when(s == T - 1)
    def _():
        hfb = hf.astype(jnp.bfloat16)
        mean_ref[...] = m_sc[...] + jnp.dot(hfb, wm_f_ref[...],
                                            preferred_element_type=jnp.float32)
        var = v_sc[...] + jnp.dot(hfb, wv_f_ref[...], preferred_element_type=jnp.float32)
        sp = jnp.maximum(var, 0.0) + jnp.log1p(jnp.exp(-jnp.abs(var)))  # stable softplus
        std_ref[...] = sp + min_std


def _rnn_layer1_last_with_head(pre1_f, out0_f, out0_b, p1,
                               wm_f, wm_b, bm, wv_f, wv_b, bv, *, min_std):
    T, B, H = pre1_f.shape
    P = wm_f.shape[1]

    def const(shape):
        return pl.BlockSpec(shape, lambda s: tuple(0 for _ in shape))

    return pl.pallas_call(
        functools.partial(_rnn_last_head_kernel, min_std=min_std),
        out_shape=(jax.ShapeDtypeStruct((B, P), jnp.float32),
                   jax.ShapeDtypeStruct((B, P), jnp.float32)),
        grid=(T,),
        in_specs=[
            pl.BlockSpec((1, B, H), lambda s: (s, 0, 0)),        # fwd pre-act at t=s
            pl.BlockSpec((1, B, H), lambda s: (T - 1, 0, 0)),    # out0_f[T-1] (resident)
            pl.BlockSpec((1, B, H), lambda s: (T - 1, 0, 0)),    # out0_b[T-1] (resident)
            const((H, H)), const((H, H)), const((1, H)),         # layer-1 bwd W_ih / bias
            const((H, H)),                                       # layer-1 fwd W_hh
            const((H, P)), const((H, P)), const((1, P)),         # mean head
            const((H, P)), const((H, P)), const((1, P)),         # variance head
        ],
        out_specs=(const((B, P)), const((B, P))),
        scratch_shapes=[pltpu.VMEM((B, H), jnp.float32),
                        pltpu.VMEM((B, P), jnp.float32),
                        pltpu.VMEM((B, P), jnp.float32)],
        compiler_params=pltpu.CompilerParams(
            dimension_semantics=("arbitrary",),
            vmem_limit_bytes=_VMEM_LIMIT),
    )(pre1_f, out0_f, out0_b,
      p1["wih_b"][0], p1["wih_b"][1], p1["bb"],
      p1["whh_f"],
      wm_f, wm_b, bm, wv_f, wv_b, bv)


# ----------------------------------------------------------------------------
# Forward pass
# ----------------------------------------------------------------------------
def plan_recognition_forward(perceptual_emb, params, *, min_std):
    """perceptual_emb: (B, T, in_features) f32 -> (mean, std) each (B, plan_features) f32."""
    # Single transpose at the input; everything else stays time-major.
    x = jnp.transpose(perceptual_emb, (1, 0, 2)).astype(jnp.bfloat16)  # (T, B, F)

    # ---- layer 0 (full bidirectional sequence output) ----
    p0 = params["l0"]
    pre0 = _input_projection([x], p0["wih"], p0["b"])                  # (T, B, 2H) f32
    out0_f, out0_b = _rnn_layer0(pre0, p0["whh_f"], p0["whh_b"])       # (T, B, H) bf16 each

    # ---- layer 1 (forward recurrence only; backward needs just one step, fused below) ----
    p1 = params["l1"]
    pre1_f = _input_projection([out0_f, out0_b], p1["wih_f"], p1["bf"])  # (T, B, H) f32
    mean, std = _rnn_layer1_last_with_head(
        pre1_f, out0_f, out0_b, p1,
        params["wm_f"], params["wm_b"], params["bm"],
        params["wv_f"], params["wv_b"], params["bv"],
        min_std=min_std)
    return mean, std


# ----------------------------------------------------------------------------
# Pure-JAX reference (mirrors the kernel's bf16-operand / f32-accumulate precision)
# ----------------------------------------------------------------------------
def _reference(perceptual_emb, params, *, min_std):
    x = jnp.transpose(perceptual_emb, (1, 0, 2)).astype(jnp.bfloat16)  # (T, B, F)
    H = params["l0"]["whh_f"].shape[0]

    def project(xs, ws, b):
        return sum(jnp.einsum("tbf,fh->tbh", a, w, preferred_element_type=jnp.float32)
                   for a, w in zip(xs, ws)) + b[None]

    def recur(pre, whh):
        B, Hh = pre.shape[1], pre.shape[2]

        def step(h, p_t):
            h_new = jnp.maximum(
                p_t + jnp.dot(h.astype(jnp.bfloat16), whh,
                              preferred_element_type=jnp.float32), 0.0)
            return h_new, h_new

        _, outs = lax.scan(step, jnp.zeros((B, Hh), jnp.float32), pre)
        return outs

    p0 = params["l0"]
    pre0 = project([x], p0["wih"], p0["b"])                    # (T, B, 2H)
    out0_f = recur(pre0[..., :H], p0["whh_f"]).astype(jnp.bfloat16)
    out0_b = jnp.flip(recur(jnp.flip(pre0[..., H:], 0), p0["whh_b"]), 0).astype(jnp.bfloat16)

    p1 = params["l1"]
    pre1_f = project([out0_f, out0_b], p1["wih_f"], p1["bf"])
    hf_last = recur(pre1_f, p1["whh_f"])[-1]                   # fwd final hidden
    # layer-1 backward: first reversed step only (h_init = 0)
    pre1_b_last = (jnp.dot(out0_f[-1], p1["wih_b"][0], preferred_element_type=jnp.float32)
                   + jnp.dot(out0_b[-1], p1["wih_b"][1], preferred_element_type=jnp.float32)
                   + p1["bb"])
    hb_last = jnp.maximum(pre1_b_last, 0.0)

    hfb = hf_last.astype(jnp.bfloat16)
    hbb = hb_last.astype(jnp.bfloat16)
    mean = (jnp.dot(hfb, params["wm_f"], preferred_element_type=jnp.float32)
            + jnp.dot(hbb, params["wm_b"], preferred_element_type=jnp.float32)
            + params["bm"])
    var = (jnp.dot(hfb, params["wv_f"], preferred_element_type=jnp.float32)
           + jnp.dot(hbb, params["wv_b"], preferred_element_type=jnp.float32)
           + params["bv"])
    std = jnp.maximum(var, 0.0) + jnp.log1p(jnp.exp(-jnp.abs(var))) + min_std
    return mean, std


# ----------------------------------------------------------------------------
# Deterministic synthetic parameters (shapes follow nn.RNN / nn.Linear, pre-transposed,
# fwd/bwd W_ih concatenated along the output dim, b_ih + b_hh folded).
# ----------------------------------------------------------------------------
def make_params(key, in_features, hidden, plan_features):
    keys = iter(jax.random.split(key, 32))

    def uni(shape, scale, dtype):
        return jax.random.uniform(next(keys), shape, jnp.float32, -scale, scale).astype(dtype)

    s = hidden ** -0.5
    sh = (2 * hidden) ** -0.5

    return {
        "l0": {
            "wih": [uni((in_features, 2 * hidden), s, jnp.bfloat16)],   # [W_ih_f^T | W_ih_b^T]
            "b": uni((1, 2 * hidden), s, jnp.float32),                  # folded biases, concat
            "whh_f": uni((hidden, hidden), s, jnp.bfloat16),
            "whh_b": uni((hidden, hidden), s, jnp.bfloat16),
        },
        "l1": {
            # layer-1 fwd W_ih^T split by layer-0 direction (input = concat(fwd, bwd))
            "wih_f": [uni((hidden, hidden), s, jnp.bfloat16),
                      uni((hidden, hidden), s, jnp.bfloat16)],
            "bf": uni((1, hidden), s, jnp.float32),
            "whh_f": uni((hidden, hidden), s, jnp.bfloat16),
            # layer-1 bwd W_ih^T split by layer-0 direction (only first reversed step used)
            "wih_b": [uni((hidden, hidden), s, jnp.bfloat16),
                      uni((hidden, hidden), s, jnp.bfloat16)],
            "bb": uni((1, hidden), s, jnp.float32),
        },
        "wm_f": uni((hidden, plan_features), sh, jnp.bfloat16),
        "wm_b": uni((hidden, plan_features), sh, jnp.bfloat16),
        "bm": uni((1, plan_features), sh, jnp.float32),
        "wv_f": uni((hidden, plan_features), sh, jnp.bfloat16),
        "wv_b": uni((hidden, plan_features), sh, jnp.bfloat16),
        "bv": uni((1, plan_features), sh, jnp.float32),
    }


# ----------------------------------------------------------------------------
if __name__ == "__main__":
    # Scaled-down shapes (the real module uses hidden=2048, heads on 4096 features).
    B, T = 2, 8
    IN_FEATURES = 64
    HIDDEN = 128
    PLAN_FEATURES = 32
    MIN_STD = 1e-3

    key = jax.random.PRNGKey(0)
    k_x, k_p = jax.random.split(key)
    perceptual_emb = jax.random.normal(k_x, (B, T, IN_FEATURES), jnp.float32)
    params = make_params(k_p, IN_FEATURES, HIDDEN, PLAN_FEATURES)

    fwd = jax.jit(lambda x, p: plan_recognition_forward(x, p, min_std=MIN_STD))
    mean, std = fwd(perceptual_emb, params)
    jax.block_until_ready((mean, std))

    ref_mean, ref_std = _reference(perceptual_emb, params, min_std=MIN_STD)

    assert mean.shape == (B, PLAN_FEATURES) and std.shape == (B, PLAN_FEATURES)
    assert bool(jnp.all(std >= MIN_STD))
    assert bool(jnp.allclose(mean, ref_mean, rtol=1e-2, atol=1e-2))
    assert bool(jnp.allclose(std, ref_std, rtol=1e-2, atol=1e-2))
    print("KERNEL_OK")
</pallas_src>

<mosaic_0001>
module attributes {stable_mosaic.version = 11 : i64} {
  func.func @_proj_kernel(%arg0: i32, %arg1: memref<1x2x64xbf16, #tpu.memory_space<vmem>>, %arg2: memref<64x256xbf16, #tpu.memory_space<vmem>>, %arg3: memref<1x256xf32, #tpu.memory_space<vmem>>, %arg4: memref<1x2x256xf32, #tpu.memory_space<vmem>>) attributes {dimension_semantics = [#tpu.dimension_semantics<parallel>], iteration_bounds = array<i64: 8>, scalar_prefetch = 0 : i64, scratch_operands = 0 : i64, tpu.core_type = #tpu.core_type<tc>, window_params = [{transform_indices = @transform_0, window_bounds = array<i64: 1, 2, 64>}, {pipeline_mode = #tpu.pipeline_mode<synchronous>, transform_indices = @transform_1, window_bounds = array<i64: 64, 256>}, {pipeline_mode = #tpu.pipeline_mode<synchronous>, transform_indices = @transform_2, window_bounds = array<i64: 1, 256>}, {transform_indices = @transform_3, window_bounds = array<i64: 1, 2, 256>}]} {
    %c0 = arith.constant 0 : index
    %c0_0 = arith.constant 0 : index
    %0 = vector.load %arg3[%c0, %c0_0] : memref<1x256xf32, #tpu.memory_space<vmem>>, vector<1x256xf32>
    %c0_1 = arith.constant 0 : index
    %c0_2 = arith.constant 0 : index
    %c0_3 = arith.constant 0 : index
    %1 = vector.load %arg1[%c0_1, %c0_2, %c0_3] : memref<1x2x64xbf16, #tpu.memory_space<vmem>>, vector<1x2x64xbf16>
    %2 = vector.shape_cast %1 : vector<1x2x64xbf16> to vector<2x64xbf16>
    %c0_4 = arith.constant 0 : index
    %c0_5 = arith.constant 0 : index
    %3 = vector.load %arg2[%c0_4, %c0_5] : memref<64x256xbf16, #tpu.memory_space<vmem>>, vector<64x256xbf16>
    %cst = arith.constant dense<0.000000e+00> : vector<2x256xf32>
    %4 = tpu.matmul %2, %3, %cst {dimension_numbers = #tpu.dot_dimension_numbers<[1], [0], [0], [1], [0, 0, 1, 1], [], []>} : vector<2x64xbf16>, vector<64x256xbf16>, vector<2x256xf32> -> vector<2x256xf32>
    %5 = vector.broadcast %0 : vector<1x256xf32> to vector<2x256xf32>
    %6 = arith.addf %5, %4 : vector<2x256xf32>
    %c0_6 = arith.constant 0 : index
    %c0_7 = arith.constant 0 : index
    %c0_8 = arith.constant 0 : index
    %7 = vector.load %arg4[%c0_6, %c0_7, %c0_8] : memref<1x2x256xf32, #tpu.memory_space<vmem>>, vector<1x2x256xf32>
    %8 = vector.shape_cast %7 : vector<1x2x256xf32> to vector<2x256xf32>
    %9 = vector.shape_cast %6 : vector<2x256xf32> to vector<1x2x256xf32>
    tpu.vector_store %arg4[%c0_6, %c0_7, %c0_8], %9 {strides = array<i32>} : memref<1x2x256xf32, #tpu.memory_space<vmem>>, vector<1x2x256xf32>,
    return
  }
  func.func @transform_0(%arg0: i32) -> (i32, i32, i32) {
    %c0_i32 = arith.constant 0 : i32
    %c0_i32_0 = arith.constant 0 : i32
    %c0_i32_1 = arith.constant 0 : i32
    return %arg0, %c0_i32, %c0_i32_0 : i32, i32, i32
  }
  func.func @transform_1(%arg0: i32) -> (i32, i32) {
    %c0_i32 = arith.constant 0 : i32
    %c0_i32_0 = arith.constant 0 : i32
    %c0_i32_1 = arith.constant 0 : i32
    return %c0_i32, %c0_i32_0 : i32, i32
  }
  func.func @transform_2(%arg0: i32) -> (i32, i32) {
    %c0_i32 = arith.constant 0 : i32
    %c0_i32_0 = arith.constant 0 : i32
    %c0_i32_1 = arith.constant 0 : i32
    return %c0_i32, %c0_i32_0 : i32, i32
  }
  func.func @transform_3(%arg0: i32) -> (i32, i32, i32) {
    %c0_i32 = arith.constant 0 : i32
    %c0_i32_0 = arith.constant 0 : i32
    %c0_i32_1 = arith.constant 0 : i32
    return %arg0, %c0_i32, %c0_i32_0 : i32, i32, i32
  }
}

module attributes {stable_mosaic.version = 11 : i64} {
  func.func @_rnn_seq_kernel(%arg0: i32, %arg1: memref<1x2x128xf32, #tpu.memory_space<vmem>>, %arg2: memref<1x2x128xf32, #tpu.memory_space<vmem>>, %arg3: memref<128x128xbf16, #tpu.memory_space<vmem>>, %arg4: memref<128x128xbf16, #tpu.memory_space<vmem>>, %arg5: memref<1x2x128xbf16, #tpu.memory_space<vmem>>, %arg6: memref<1x2x128xbf16, #tpu.memory_space<vmem>>, %arg7: memref<2x128xf32, #tpu.memory_space<vmem>>, %arg8: memref<2x128xf32, #tpu.memory_space<vmem>>) attributes {dimension_semantics = [#tpu.dimension_semantics<arbitrary>], iteration_bounds = array<i64: 8>, scalar_prefetch = 0 : i64, scratch_operands = 2 : i64, tpu.core_type = #tpu.core_type<tc>, window_params = [{transform_indices = @transform_0, window_bounds = array<i64: 1, 2, 128>}, {transform_indices = @transform_1, window_bounds = array<i64: 1, 2, 128>}, {pipeline_mode = #tpu.pipeline_mode<synchronous>, transform_indices = @transform_2, window_bounds = array<i64: 128, 128>}, {pipeline_mode = #tpu.pipeline_mode<synchronous>, transform_indices = @transform_3, window_bounds = array<i64: 128, 128>}, {transform_indices = @transform_4, window_bounds = array<i64: 1, 2, 128>}, {transform_indices = @transform_5, window_bounds = array<i64: 1, 2, 128>}]} {
    %c0_i32 = arith.constant 0 : i32
    %0 = arith.cmpi eq, %arg0, %c0_i32 : i32
    %1 = arith.extui %0 : i1 to i32
    %c0_i32_0 = arith.constant 0 : i32
    %2 = arith.cmpi ne, %1, %c0_i32_0 : i32
    scf.if %2 {
      %cst_27 = arith.constant 0.000000e+00 : f32
      %31 = vector.broadcast %cst_27 : f32 to vector<2x128xf32>
      %c0_28 = arith.constant 0 : index
      %c0_29 = arith.constant 0 : index
      %32 = vector.load %arg7[%c0_28, %c0_29] : memref<2x128xf32, #tpu.memory_space<vmem>>, vector<2x128xf32>
      tpu.vector_store %arg7[%c0_28, %c0_29], %31 {strides = array<i32>} : memref<2x128xf32, #tpu.memory_space<vmem>>, vector<2x128xf32>,
      %cst_30 = arith.constant 0.000000e+00 : f32
      %33 = vector.broadcast %cst_30 : f32 to vector<2x128xf32>
      %c0_31 = arith.constant 0 : index
      %c0_32 = arith.constant 0 : index
      %34 = vector.load %arg8[%c0_31, %c0_32] : memref<2x128xf32, #tpu.memory_space<vmem>>, vector<2x128xf32>
      tpu.vector_store %arg8[%c0_31, %c0_32], %33 {strides = array<i32>} : memref<2x128xf32, #tpu.memory_space<vmem>>, vector<2x128xf32>,
    } else {
    }
    %c0 = arith.constant 0 : index
    %c0_1 = arith.constant 0 : index
    %c0_2 = arith.constant 0 : index
    %3 = vector.load %arg1[%c0, %c0_1, %c0_2] : memref<1x2x128xf32, #tpu.memory_space<vmem>>, vector<1x2x128xf32>
    %4 = vector.shape_cast %3 : vector<1x2x128xf32> to vector<2x128xf32>
    %c0_3 = arith.constant 0 : index
    %c0_4 = arith.constant 0 : index
    %5 = vector.load %arg7[%c0_3, %c0_4] : memref<2x128xf32, #tpu.memory_space<vmem>>, vector<2x128xf32>
    %6 = arith.truncf %5 : vector<2x128xf32> to vector<2x128xbf16>
    %c0_5 = arith.constant 0 : index
    %c0_6 = arith.constant 0 : index
    %7 = vector.load %arg3[%c0_5, %c0_6] : memref<128x128xbf16, #tpu.memory_space<vmem>>, vector<128x128xbf16>
    %cst = arith.constant dense<0.000000e+00> : vector<2x128xf32>
    %8 = tpu.matmul %6, %7, %cst {dimension_numbers = #tpu.dot_dimension_numbers<[1], [0], [0], [1], [0, 0, 1, 1], [], []>} : vector<2x128xbf16>, vector<128x128xbf16>, vector<2x128xf32> -> vector<2x128xf32>
    %9 = arith.addf %4, %8 : vector<2x128xf32>
    %cst_7 = arith.constant 0.000000e+00 : f32
    %10 = vector.broadcast %cst_7 : f32 to vector<2x128xf32>
    %11 = arith.maximumf %9, %10 : vector<2x128xf32>
    %c0_8 = arith.constant 0 : index
    %c0_9 = arith.constant 0 : index
    %c0_10 = arith.constant 0 : index
    %12 = vector.load %arg2[%c0_8, %c0_9, %c0_10] : memref<1x2x128xf32, #tpu.memory_space<vmem>>, vector<1x2x128xf32>
    %13 = vector.shape_cast %12 : vector<1x2x128xf32> to vector<2x128xf32>
    %c0_11 = arith.constant 0 : index
    %c0_12 = arith.constant 0 : index
    %14 = vector.load %arg8[%c0_11, %c0_12] : memref<2x128xf32, #tpu.memory_space<vmem>>, vector<2x128xf32>
    %15 = arith.truncf %14 : vector<2x128xf32> to vector<2x128xbf16>
    %c0_13 = arith.constant 0 : index
    %c0_14 = arith.constant 0 : index
    %16 = vector.load %arg4[%c0_13, %c0_14] : memref<128x128xbf16, #tpu.memory_space<vmem>>, vector<128x128xbf16>
    %cst_15 = arith.constant dense<0.000000e+00> : vector<2x128xf32>
    %17 = tpu.matmul %15, %16, %cst_15 {dimension_numbers = #tpu.dot_dimension_numbers<[1], [0], [0], [1], [0, 0, 1, 1], [], []>} : vector<2x128xbf16>, vector<128x128xbf16>, vector<2x128xf32> -> vector<2x128xf32>
    %18 = arith.addf %13, %17 : vector<2x128xf32>
    %cst_16 = arith.constant 0.000000e+00 : f32
    %19 = vector.broadcast %cst_16 : f32 to vector<2x128xf32>
    %20 = arith.maximumf %18, %19 : vector<2x128xf32>
    %c0_17 = arith.constant 0 : index
    %c0_18 = arith.constant 0 : index
    %21 = vector.load %arg7[%c0_17, %c0_18] : memref<2x128xf32, #tpu.memory_space<vmem>>, vector<2x128xf32>
    tpu.vector_store %arg7[%c0_17, %c0_18], %11 {strides = array<i32>} : memref<2x128xf32, #tpu.memory_space<vmem>>, vector<2x128xf32>,
    %c0_19 = arith.constant 0 : index
    %c0_20 = arith.constant 0 : index
    %22 = vector.load %arg8[%c0_19, %c0_20] : memref<2x128xf32, #tpu.memory_space<vmem>>, vector<2x128xf32>
    tpu.vector_store %arg8[%c0_19, %c0_20], %20 {strides = array<i32>} : memref<2x128xf32, #tpu.memory_space<vmem>>, vector<2x128xf32>,
    %23 = arith.truncf %11 : vector<2x128xf32> to vector<2x128xbf16>
    %c0_21 = arith.constant 0 : index
    %c0_22 = arith.constant 0 : index
    %c0_23 = arith.constant 0 : index
    %24 = vector.load %arg5[%c0_21, %c0_22, %c0_23] : memref<1x2x128xbf16, #tpu.memory_space<vmem>>, vector<1x2x128xbf16>
    %25 = vector.shape_cast %24 : vector<1x2x128xbf16> to vector<2x128xbf16>
    %26 = vector.shape_cast %23 : vector<2x128xbf16> to vector<1x2x128xbf16>
    tpu.vector_store %arg5[%c0_21, %c0_22, %c0_23], %26 {strides = array<i32>} : memref<1x2x128xbf16, #tpu.memory_space<vmem>>, vector<1x2x128xbf16>,
    %27 = arith.truncf %20 : vector<2x128xf32> to vector<2x128xbf16>
    %c0_24 = arith.constant 0 : index
    %c0_25 = arith.constant 0 : index
    %c0_26 = arith.constant 0 : index
    %28 = vector.load %arg6[%c0_24, %c0_25, %c0_26] : memref<1x2x128xbf16, #tpu.memory_space<vmem>>, vector<1x2x128xbf16>
    %29 = vector.shape_cast %28 : vector<1x2x128xbf16> to vector<2x128xbf16>
    %30 = vector.shape_cast %27 : vector<2x128xbf16> to vector<1x2x128xbf16>
    tpu.vector_store %arg6[%c0_24, %c0_25, %c0_26], %30 {strides = array<i32>} : memref<1x2x128xbf16, #tpu.memory_space<vmem>>, vector<1x2x128xbf16>,
    return
  }
  func.func @transform_0(%arg0: i32) -> (i32, i32, i32) {
    %c0_i32 = arith.constant 0 : i32
    %c0_i32_0 = arith.constant 0 : i32
    %c0_i32_1 = arith.constant 0 : i32
    return %arg0, %c0_i32, %c0_i32_0 : i32, i32, i32
  }
  func.func @transform_1(%arg0: i32) -> (i32, i32, i32) {
    %c7_i32 = arith.constant 7 : i32
    %0 = arith.subi %c7_i32, %arg0 : i32
    %c0_i32 = arith.constant 0 : i32
    %c1_i32 = arith.constant 1 : i32
    %c0_i32_0 = arith.constant 0 : i32
    return %0, %c0_i32, %c1_i32 : i32, i32, i32
  }
  func.func @transform_2(%arg0: i32) -> (i32, i32) {
    %c0_i32 = arith.constant 0 : i32
    %c0_i32_0 = arith.constant 0 : i32
    %c0_i32_1 = arith.constant 0 : i32
    return %c0_i32, %c0_i32_0 : i32, i32
  }
  func.func @transform_3(%arg0: i32) -> (i32, i32) {
    %c0_i32 = arith.constant 0 : i32
    %c0_i32_0 = arith.constant 0 : i32
    %c0_i32_1 = arith.constant 0 : i32
    return %c0_i32, %c0_i32_0 : i32, i32
  }
  func.func @transform_4(%arg0: i32) -> (i32, i32, i32) {
    %c0_i32 = arith.constant 0 : i32
    %c0_i32_0 = arith.constant 0 : i32
    %c0_i32_1 = arith.constant 0 : i32
    return %arg0, %c0_i32, %c0_i32_0 : i32, i32, i32
  }
  func.func @transform_5(%arg0: i32) -> (i32, i32, i32) {
    %c7_i32 = arith.constant 7 : i32
    %0 = arith.subi %c7_i32, %arg0 : i32
    %c0_i32 = arith.constant 0 : i32
    %c0_i32_0 = arith.constant 0 : i32
    %c0_i32_1 = arith.constant 0 : i32
    return %0, %c0_i32, %c0_i32_0 : i32, i32, i32
  }
}

module attributes {stable_mosaic.version = 11 : i64} {
  func.func @_proj_kernel(%arg0: i32, %arg1: memref<1x2x128xbf16, #tpu.memory_space<vmem>>, %arg2: memref<1x2x128xbf16, #tpu.memory_space<vmem>>, %arg3: memref<128x128xbf16, #tpu.memory_space<vmem>>, %arg4: memref<128x128xbf16, #tpu.memory_space<vmem>>, %arg5: memref<1x128xf32, #tpu.memory_space<vmem>>, %arg6: memref<1x2x128xf32, #tpu.memory_space<vmem>>) attributes {dimension_semantics = [#tpu.dimension_semantics<parallel>], iteration_bounds = array<i64: 8>, scalar_prefetch = 0 : i64, scratch_operands = 0 : i64, tpu.core_type = #tpu.core_type<tc>, window_params = [{transform_indices = @transform_0, window_bounds = array<i64: 1, 2, 128>}, {transform_indices = @transform_1, window_bounds = array<i64: 1, 2, 128>}, {pipeline_mode = #tpu.pipeline_mode<synchronous>, transform_indices = @transform_2, window_bounds = array<i64: 128, 128>}, {pipeline_mode = #tpu.pipeline_mode<synchronous>, transform_indices = @transform_3, window_bounds = array<i64: 128, 128>}, {pipeline_mode = #tpu.pipeline_mode<synchronous>, transform_indices = @transform_4, window_bounds = array<i64: 1, 128>}, {transform_indices = @transform_5, window_bounds = array<i64: 1, 2, 128>}]} {
    %c0 = arith.constant 0 : index
    %c0_0 = arith.constant 0 : index
    %0 = vector.load %arg5[%c0, %c0_0] : memref<1x128xf32, #tpu.memory_space<vmem>>, vector<1x128xf32>
    %c0_1 = arith.constant 0 : index
    %c0_2 = arith.constant 0 : index
    %c0_3 = arith.constant 0 : index
    %1 = vector.load %arg1[%c0_1, %c0_2, %c0_3] : memref<1x2x128xbf16, #tpu.memory_space<vmem>>, vector<1x2x128xbf16>
    %2 = vector.shape_cast %1 : vector<1x2x128xbf16> to vector<2x128xbf16>
    %c0_4 = arith.constant 0 : index
    %c0_5 = arith.constant 0 : index
    %3 = vector.load %arg3[%c0_4, %c0_5] : memref<128x128xbf16, #tpu.memory_space<vmem>>, vector<128x128xbf16>
    %cst = arith.constant dense<0.000000e+00> : vector<2x128xf32>
    %4 = tpu.matmul %2, %3, %cst {dimension_numbers = #tpu.dot_dimension_numbers<[1], [0], [0], [1], [0, 0, 1, 1], [], []>} : vector<2x128xbf16>, vector<128x128xbf16>, vector<2x128xf32> -> vector<2x128xf32>
    %5 = vector.broadcast %0 : vector<1x128xf32> to vector<2x128xf32>
    %6 = arith.addf %5, %4 : vector<2x128xf32>
    %c0_6 = arith.constant 0 : index
    %c0_7 = arith.constant 0 : index
    %c0_8 = arith.constant 0 : index
    %7 = vector.load %arg2[%c0_6, %c0_7, %c0_8] : memref<1x2x128xbf16, #tpu.memory_space<vmem>>, vector<1x2x128xbf16>
    %8 = vector.shape_cast %7 : vector<1x2x128xbf16> to vector<2x128xbf16>
    %c0_9 = arith.constant 0 : index
    %c0_10 = arith.constant 0 : index
    %9 = vector.load %arg4[%c0_9, %c0_10] : memref<128x128xbf16, #tpu.memory_space<vmem>>, vector<128x128xbf16>
    %cst_11 = arith.constant dense<0.000000e+00> : vector<2x128xf32>
    %10 = tpu.matmul %8, %9, %cst_11 {dimension_numbers = #tpu.dot_dimension_numbers<[1], [0], [0], [1], [0, 0, 1, 1], [], []>} : vector<2x128xbf16>, vector<128x128xbf16>, vector<2x128xf32> -> vector<2x128xf32>
    %11 = arith.addf %6, %10 : vector<2x128xf32>
    %c0_12 = arith.constant 0 : index
    %c0_13 = arith.constant 0 : index
    %c0_14 = arith.constant 0 : index
    %12 = vector.load %arg6[%c0_12, %c0_13, %c0_14] : memref<1x2x128xf32, #tpu.memory_space<vmem>>, vector<1x2x128xf32>
    %13 = vector.shape_cast %12 : vector<1x2x128xf32> to vector<2x128xf32>
    %14 = vector.shape_cast %11 : vector<2x128xf32> to vector<1x2x128xf32>
    tpu.vector_store %arg6[%c0_12, %c0_13, %c0_14], %14 {strides = array<i32>} : memref<1x2x128xf32, #tpu.memory_space<vmem>>, vector<1x2x128xf32>,
    return
  }
  func.func @transform_0(%arg0: i32) -> (i32, i32, i32) {
    %c0_i32 = arith.constant 0 : i32
    %c0_i32_0 = arith.constant 0 : i32
    %c0_i32_1 = arith.constant 0 : i32
    return %arg0, %c0_i32, %c0_i32_0 : i32, i32, i32
  }
  func.func @transform_1(%arg0: i32) -> (i32, i32, i32) {
    %c0_i32 = arith.constant 0 : i32
    %c0_i32_0 = arith.constant 0 : i32
    %c0_i32_1 = arith.constant 0 : i32
    return %arg0, %c0_i32, %c0_i32_0 : i32, i32, i32
  }
  func.func @transform_2(%arg0: i32) -> (i32, i32) {
    %c0_i32 = arith.constant 0 : i32
    %c0_i32_0 = arith.constant 0 : i32
    %c0_i32_1 = arith.constant 0 : i32
    return %c0_i32, %c0_i32_0 : i32, i32
  }
  func.func @transform_3(%arg0: i32) -> (i32, i32) {
    %c0_i32 = arith.constant 0 : i32
    %c0_i32_0 = arith.constant 0 : i32
    %c0_i32_1 = arith.constant 0 : i32
    return %c0_i32, %c0_i32_0 : i32, i32
  }
  func.func @transform_4(%arg0: i32) -> (i32, i32) {
    %c0_i32 = arith.constant 0 : i32
    %c0_i32_0 = arith.constant 0 : i32
    %c0_i32_1 = arith.constant 0 : i32
    return %c0_i32, %c0_i32_0 : i32, i32
  }
  func.func @transform_5(%arg0: i32) -> (i32, i32, i32) {
    %c0_i32 = arith.constant 0 : i32
    %c0_i32_0 = arith.constant 0 : i32
    %c0_i32_1 = arith.constant 0 : i32
    return %arg0, %c0_i32, %c0_i32_0 : i32, i32, i32
  }
}

module attributes {stable_mosaic.version = 11 : i64} {
  func.func @_rnn_last_head_kernel(%arg0: i32, %arg1: memref<1x2x128xf32, #tpu.memory_space<vmem>>, %arg2: memref<1x2x128xbf16, #tpu.memory_space<vmem>>, %arg3: memref<1x2x128xbf16, #tpu.memory_space<vmem>>, %arg4: memref<128x128xbf16, #tpu.memory_space<vmem>>, %arg5: memref<128x128xbf16, #tpu.memory_space<vmem>>, %arg6: memref<1x128xf32, #tpu.memory_space<vmem>>, %arg7: memref<128x128xbf16, #tpu.memory_space<vmem>>, %arg8: memref<128x32xbf16, #tpu.memory_space<vmem>>, %arg9: memref<128x32xbf16, #tpu.memory_space<vmem>>, %arg10: memref<1x32xf32, #tpu.memory_space<vmem>>, %arg11: memref<128x32xbf16, #tpu.memory_space<vmem>>, %arg12: memref<128x32xbf16, #tpu.memory_space<vmem>>, %arg13: memref<1x32xf32, #tpu.memory_space<vmem>>, %arg14: memref<2x32xf32, #tpu.memory_space<vmem>>, %arg15: memref<2x32xf32, #tpu.memory_space<vmem>>, %arg16: memref<2x128xf32, #tpu.memory_space<vmem>>, %arg17: memref<2x32xf32, #tpu.memory_space<vmem>>, %arg18: memref<2x32xf32, #tpu.memory_space<vmem>>) attributes {dimension_semantics = [#tpu.dimension_semantics<arbitrary>], iteration_bounds = array<i64: 8>, scalar_prefetch = 0 : i64, scratch_operands = 3 : i64, tpu.core_type = #tpu.core_type<tc>, window_params = [{transform_indices = @transform_0, window_bounds = array<i64: 1, 2, 128>}, {transform_indices = @transform_1, window_bounds = array<i64: 1, 2, 128>}, {transform_indices = @transform_2, window_bounds = array<i64: 1, 2, 128>}, {pipeline_mode = #tpu.pipeline_mode<synchronous>, transform_indices = @transform_3, window_bounds = array<i64: 128, 128>}, {pipeline_mode = #tpu.pipeline_mode<synchronous>, transform_indices = @transform_4, window_bounds = array<i64: 128, 128>}, {pipeline_mode = #tpu.pipeline_mode<synchronous>, transform_indices = @transform_5, window_bounds = array<i64: 1, 128>}, {pipeline_mode = #tpu.pipeline_mode<synchronous>, transform_indices = @transform_6, window_bounds = array<i64: 128, 128>}, {pipeline_mode = #tpu.pipeline_mode<synchronous>, transform_indices = @transform_7, window_bounds = array<i64: 128, 32>}, {pipeline_mode = #tpu.pipeline_mode<synchronous>, transform_indices = @transform_8, window_bounds = array<i64: 128, 32>}, {pipeline_mode = #tpu.pipeline_mode<synchronous>, transform_indices = @transform_9, window_bounds = array<i64: 1, 32>}, {pipeline_mode = #tpu.pipeline_mode<synchronous>, transform_indices = @transform_10, window_bounds = array<i64: 128, 32>}, {pipeline_mode = #tpu.pipeline_mode<synchronous>, transform_indices = @transform_11, window_bounds = array<i64: 128, 32>}, {pipeline_mode = #tpu.pipeline_mode<synchronous>, transform_indices = @transform_12, window_bounds = array<i64: 1, 32>}, {pipeline_mode = #tpu.pipeline_mode<synchronous>, transform_indices = @transform_13, window_bounds = array<i64: 2, 32>}, {pipeline_mode = #tpu.pipeline_mode<synchronous>, transform_indices = @transform_14, window_bounds = array<i64: 2, 32>}]} {
    %c0_i32 = arith.constant 0 : i32
    %0 = arith.cmpi eq, %arg0, %c0_i32 : i32
    %1 = arith.extui %0 : i1 to i32
    %c0_i32_0 = arith.constant 0 : i32
    %2 = arith.cmpi ne, %1, %c0_i32_0 : i32
    scf.if %2 {
      %cst_11 = arith.constant 0.000000e+00 : f32
      %16 = vector.broadcast %cst_11 : f32 to vector<2x128xf32>
      %c0_12 = arith.constant 0 : index
      %c0_13 = arith.constant 0 : index
      %17 = vector.load %arg16[%c0_12, %c0_13] : memref<2x128xf32, #tpu.memory_space<vmem>>, vector<2x128xf32>
      tpu.vector_store %arg16[%c0_12, %c0_13], %16 {strides = array<i32>} : memref<2x128xf32, #tpu.memory_space<vmem>>, vector<2x128xf32>,
      %c0_14 = arith.constant 0 : index
      %c0_15 = arith.constant 0 : index
      %c0_16 = arith.constant 0 : index
      %18 = vector.load %arg2[%c0_14, %c0_15, %c0_16] : memref<1x2x128xbf16, #tpu.memory_space<vmem>>, vector<1x2x128xbf16>
      %19 = vector.shape_cast %18 : vector<1x2x128xbf16> to vector<2x128xbf16>
      %c0_17 = arith.constant 0 : index
      %c0_18 = arith.constant 0 : index
      %20 = vector.load %arg4[%c0_17, %c0_18] : memref<128x128xbf16, #tpu.memory_space<vmem>>, vector<128x128xbf16>
      %cst_19 = arith.constant dense<0.000000e+00> : vector<2x128xf32>
      %21 = tpu.matmul %19, %20, %cst_19 {dimension_numbers = #tpu.dot_dimension_numbers<[1], [0], [0], [1], [0, 0, 1, 1], [], []>} : vector<2x128xbf16>, vector<128x128xbf16>, vector<2x128xf32> -> vector<2x128xf32>
      %c0_20 = arith.constant 0 : index
      %c0_21 = arith.constant 0 : index
      %c0_22 = arith.constant 0 : index
      %22 = vector.load %arg3[%c0_20, %c0_21, %c0_22] : memref<1x2x128xbf16, #tpu.memory_space<vmem>>, vector<1x2x128xbf16>
      %23 = vector.shape_cast %22 : vector<1x2x128xbf16> to vector<2x128xbf16>
      %c0_23 = arith.constant 0 : index
      %c0_24 = arith.constant 0 : index
      %24 = vector.load %arg5[%c0_23, %c0_24] : memref<128x128xbf16, #tpu.memory_space<vmem>>, vector<128x128xbf16>
      %cst_25 = arith.constant dense<0.000000e+00> : vector<2x128xf32>
      %25 = tpu.matmul %23, %24, %cst_25 {dimension_numbers = #tpu.dot_dimension_numbers<[1], [0], [0], [1], [0, 0, 1, 1], [], []>} : vector<2x128xbf16>, vector<128x128xbf16>, vector<2x128xf32> -> vector<2x128xf32>
      %26 = arith.addf %21, %25 : vector<2x128xf32>
      %c0_26 = arith.constant 0 : index
      %c0_27 = arith.constant 0 : index
      %27 = vector.load %arg6[%c0_26, %c0_27] : memref<1x128xf32, #tpu.memory_space<vmem>>, vector<1x128xf32>
      %28 = vector.broadcast %27 : vector<1x128xf32> to vector<2x128xf32>
      %29 = arith.addf %26, %28 : vector<2x128xf32>
      %cst_28 = arith.constant 0.000000e+00 : f32
      %30 = vector.broadcast %cst_28 : f32 to vector<2x128xf32>
      %31 = arith.maximumf %29, %30 : vector<2x128xf32>
      %32 = arith.truncf %31 : vector<2x128xf32> to vector<2x128xbf16>
      %c0_29 = arith.constant 0 : index
      %c0_30 = arith.constant 0 : index
      %33 = vector.load %arg9[%c0_29, %c0_30] : memref<128x32xbf16, #tpu.memory_space<vmem>>, vector<128x32xbf16>
      %cst_31 = arith.constant dense<0.000000e+00> : vector<2x32xf32>
      %34 = tpu.matmul %32, %33, %cst_31 {dimension_numbers = #tpu.dot_dimension_numbers<[1], [0], [0], [1], [0, 0, 1, 1], [], []>} : vector<2x128xbf16>, vector<128x32xbf16>, vector<2x32xf32> -> vector<2x32xf32>
      %c0_32 = arith.constant 0 : index
      %c0_33 = arith.constant 0 : index
      %35 = vector.load %arg10[%c0_32, %c0_33] : memref<1x32xf32, #tpu.memory_space<vmem>>, vector<1x32xf32>
      %36 = vector.broadcast %35 : vector<1x32xf32> to vector<2x32xf32>
      %37 = arith.addf %34, %36 : vector<2x32xf32>
      %c0_34 = arith.constant 0 : index
      %c0_35 = arith.constant 0 : index
      %38 = vector.load %arg17[%c0_34, %c0_35] : memref<2x32xf32, #tpu.memory_space<vmem>>, vector<2x32xf32>
      tpu.vector_store %arg17[%c0_34, %c0_35], %37 {strides = array<i32>} : memref<2x32xf32, #tpu.memory_space<vmem>>, vector<2x32xf32>,
      %c0_36 = arith.constant 0 : index
      %c0_37 = arith.constant 0 : index
      %39 = vector.load %arg12[%c0_36, %c0_37] : memref<128x32xbf16, #tpu.memory_space<vmem>>, vector<128x32xbf16>
      %cst_38 = arith.constant dense<0.000000e+00> : vector<2x32xf32>
      %40 = tpu.matmul %32, %39, %cst_38 {dimension_numbers = #tpu.dot_dimension_numbers<[1], [0], [0], [1], [0, 0, 1, 1], [], []>} : vector<2x128xbf16>, vector<128x32xbf16>, vector<2x32xf32> -> vector<2x32xf32>
      %c0_39 = arith.constant 0 : index
      %c0_40 = arith.constant 0 : index
      %41 = vector.load %arg13[%c0_39, %c0_40] : memref<1x32xf32, #tpu.memory_space<vmem>>, vector<1x32xf32>
      %42 = vector.broadcast %41 : vector<1x32xf32> to vector<2x32xf32>
      %43 = arith.addf %40, %42 : vector<2x32xf32>
      %c0_41 = arith.constant 0 : index
      %c0_42 = arith.constant 0 : index
      %44 = vector.load %arg18[%c0_41, %c0_42] : memref<2x32xf32, #tpu.memory_space<vmem>>, vector<2x32xf32>
      tpu.vector_store %arg18[%c0_41, %c0_42], %43 {strides = array<i32>} : memref<2x32xf32, #tpu.memory_space<vmem>>, vector<2x32xf32>,
    } else {
    }
    %c0 = arith.constant 0 : index
    %c0_1 = arith.constant 0 : index
    %c0_2 = arith.constant 0 : index
    %3 = vector.load %arg1[%c0, %c0_1, %c0_2] : memref<1x2x128xf32, #tpu.memory_space<vmem>>, vector<1x2x128xf32>
    %4 = vector.shape_cast %3 : vector<1x2x128xf32> to vector<2x128xf32>
    %c0_3 = arith.constant 0 : index
    %c0_4 = arith.constant 0 : index
    %5 = vector.load %arg16[%c0_3, %c0_4] : memref<2x128xf32, #tpu.memory_space<vmem>>, vector<2x128xf32>
    %6 = arith.truncf %5 : vector<2x128xf32> to vector<2x128xbf16>
    %c0_5 = arith.constant 0 : index
    %c0_6 = arith.constant 0 : index
    %7 = vector.load %arg7[%c0_5, %c0_6] : memref<128x128xbf16, #tpu.memory_space<vmem>>, vector<128x128xbf16>
    %cst = arith.constant dense<0.000000e+00> : vector<2x128xf32>
    %8 = tpu.matmul %6, %7, %cst {dimension_numbers = #tpu.dot_dimension_numbers<[1], [0], [0], [1], [0, 0, 1, 1], [], []>} : vector<2x128xbf16>, vector<128x128xbf16>, vector<2x128xf32> -> vector<2x128xf32>
    %9 = arith.addf %4, %8 : vector<2x128xf32>
    %cst_7 = arith.constant 0.000000e+00 : f32
    %10 = vector.broadcast %cst_7 : f32 to vector<2x128xf32>
    %11 = arith.maximumf %9, %10 : vector<2x128xf32>
    %c0_8 = arith.constant 0 : index
    %c0_9 = arith.constant 0 : index
    %12 = vector.load %arg16[%c0_8, %c0_9] : memref<2x128xf32, #tpu.memory_space<vmem>>, vector<2x128xf32>
    tpu.vector_store %arg16[%c0_8, %c0_9], %11 {strides = array<i32>} : memref<2x128xf32, #tpu.memory_space<vmem>>, vector<2x128xf32>,
    %c7_i32 = arith.constant 7 : i32
    %13 = arith.cmpi eq, %arg0, %c7_i32 : i32
    %14 = arith.extui %13 : i1 to i32
    %c0_i32_10 = arith.constant 0 : i32
    %15 = arith.cmpi ne, %14, %c0_i32_10 : i32
    scf.if %15 {
      %16 = arith.truncf %11 : vector<2x128xf32> to vector<2x128xbf16>
      %c0_11 = arith.constant 0 : index
      %c0_12 = arith.constant 0 : index
      %17 = vector.load %arg17[%c0_11, %c0_12] : memref<2x32xf32, #tpu.memory_space<vmem>>, vector<2x32xf32>
      %c0_13 = arith.constant 0 : index
      %c0_14 = arith.constant 0 : index
      %18 = vector.load %arg8[%c0_13, %c0_14] : memref<128x32xbf16, #tpu.memory_space<vmem>>, vector<128x32xbf16>
      %cst_15 = arith.constant dense<0.000000e+00> : vector<2x32xf32>
      %19 = tpu.matmul %16, %18, %cst_15 {dimension_numbers = #tpu.dot_dimension_numbers<[1], [0], [0], [1], [0, 0, 1, 1], [], []>} : vector<2x128xbf16>, vector<128x32xbf16>, vector<2x32xf32> -> vector<2x32xf32>
      %20 = arith.addf %17, %19 : vector<2x32xf32>
      %c0_16 = arith.constant 0 : index
      %c0_17 = arith.constant 0 : index
      %21 = vector.load %arg14[%c0_16, %c0_17] : memref<2x32xf32, #tpu.memory_space<vmem>>, vector<2x32xf32>
      tpu.vector_store %arg14[%c0_16, %c0_17], %20 {strides = array<i32>} : memref<2x32xf32, #tpu.memory_space<vmem>>, vector<2x32xf32>,
      %c0_18 = arith.constant 0 : index
      %c0_19 = arith.constant 0 : index
      %22 = vector.load %arg18[%c0_18, %c0_19] : memref<2x32xf32, #tpu.memory_space<vmem>>, vector<2x32xf32>
      %c0_20 = arith.constant 0 : index
      %c0_21 = arith.constant 0 : index
      %23 = vector.load %arg11[%c0_20, %c0_21] : memref<128x32xbf16, #tpu.memory_space<vmem>>, vector<128x32xbf16>
      %cst_22 = arith.constant dense<0.000000e+00> : vector<2x32xf32>
      %24 = tpu.matmul %16, %23, %cst_22 {dimension_numbers = #tpu.dot_dimension_numbers<[1], [0], [0], [1], [0, 0, 1, 1], [], []>} : vector<2x128xbf16>, vector<128x32xbf16>, vector<2x32xf32> -> vector<2x32xf32>
      %25 = arith.addf %22, %24 : vector<2x32xf32>
      %cst_23 = arith.constant 0.000000e+00 : f32
      %26 = vector.broadcast %cst_23 : f32 to vector<2x32xf32>
      %27 = arith.maximumf %25, %26 : vector<2x32xf32>
      %28 = math.absf %25 : vector<2x32xf32>
      %cst_24 = arith.constant 0.000000e+00 : f32
      %29 = vector.broadcast %cst_24 : f32 to vector<2x32xf32>
      %30 = arith.subf %29, %28 : vector<2x32xf32>
      %31 = math.exp %30 : vector<2x32xf32>
      %32 = math.log1p %31 : vector<2x32xf32>
      %33 = arith.addf %27, %32 : vector<2x32xf32>
      %cst_25 = arith.constant 1.000000e-03 : f32
      %34 = vector.broadcast %cst_25 : f32 to vector<2x32xf32>
      %35 = arith.addf %33, %34 : vector<2x32xf32>
      %c0_26 = arith.constant 0 : index
      %c0_27 = arith.constant 0 : index
      %36 = vector.load %arg15[%c0_26, %c0_27] : memref<2x32xf32, #tpu.memory_space<vmem>>, vector<2x32xf32>
      tpu.vector_store %arg15[%c0_26, %c0_27], %35 {strides = array<i32>} : memref<2x32xf32, #tpu.memory_space<vmem>>, vector<2x32xf32>,
    } else {
    }
    return
  }
  func.func @transform_0(%arg0: i32) -> (i32, i32, i32) {
    %c0_i32 = arith.constant 0 : i32
    %c0_i32_0 = arith.constant 0 : i32
    %c0_i32_1 = arith.constant 0 : i32
    return %arg0, %c0_i32, %c0_i32_0 : i32, i32, i32
  }
  func.func @transform_1(%arg0: i32) -> (i32, i32, i32) {
    %c7_i32 = arith.constant 7 : i32
    %c0_i32 = arith.constant 0 : i32
    %c0_i32_0 = arith.constant 0 : i32
    %c0_i32_1 = arith.constant 0 : i32
    return %c7_i32, %c0_i32, %c0_i32_0 : i32, i32, i32
  }
  func.func @transform_2(%arg0: i32) -> (i32, i32, i32) {
    %c7_i32 = arith.constant 7 : i32
    %c0_i32 = arith.constant 0 : i32
    %c0_i32_0 = arith.constant 0 : i32
    %c0_i32_1 = arith.constant 0 : i32
    return %c7_i32, %c0_i32, %c0_i32_0 : i32, i32, i32
  }
  func.func @transform_3(%arg0: i32) -> (i32, i32) {
    %c0_i32 = arith.constant 0 : i32
    %c0_i32_0 = arith.constant 0 : i32
    %c0_i32_1 = arith.constant 0 : i32
    return %c0_i32, %c0_i32_0 : i32, i32
  }
  func.func @transform_4(%arg0: i32) -> (i32, i32) {
    %c0_i32 = arith.constant 0 : i32
    %c0_i32_0 = arith.constant 0 : i32
    %c0_i32_1 = arith.constant 0 : i32
    return %c0_i32, %c0_i32_0 : i32, i32
  }
  func.func @transform_5(%arg0: i32) -> (i32, i32) {
    %c0_i32 = arith.constant 0 : i32
    %c0_i32_0 = arith.constant 0 : i32
    %c0_i32_1 = arith.constant 0 : i32
    return %c0_i32, %c0_i32_0 : i32, i32
  }
  func.func @transform_6(%arg0: i32) -> (i32, i32) {
    %c0_i32 = arith.constant 0 : i32
    %c0_i32_0 = arith.constant 0 : i32
    %c0_i32_1 = arith.constant 0 : i32
    return %c0_i32, %c0_i32_0 : i32, i32
  }
  func.func @transform_7(%arg0: i32) -> (i32, i32) {
    %c0_i32 = arith.constant 0 : i32
    %c0_i32_0 = arith.constant 0 : i32
    %c0_i32_1 = arith.constant 0 : i32
    return %c0_i32, %c0_i32_0 : i32, i32
  }
  func.func @transform_8(%arg0: i32) -> (i32, i32) {
    %c0_i32 = arith.constant 0 : i32
    %c0_i32_0 = arith.constant 0 : i32
    %c0_i32_1 = arith.constant 0 : i32
    return %c0_i32, %c0_i32_0 : i32, i32
  }
  func.func @transform_9(%arg0: i32) -> (i32, i32) {
    %c0_i32 = arith.constant 0 : i32
    %c0_i32_0 = arith.constant 0 : i32
    %c0_i32_1 = arith.constant 0 : i32
    return %c0_i32, %c0_i32_0 : i32, i32
  }
  func.func @transform_10(%arg0: i32) -> (i32, i32) {
    %c0_i32 = arith.constant 0 : i32
    %c0_i32_0 = arith.constant 0 : i32
    %c0_i32_1 = arith.constant 0 : i32
    return %c0_i32, %c0_i32_0 : i32, i32
  }
  func.func @transform_11(%arg0: i32) -> (i32, i32) {
    %c0_i32 = arith.constant 0 : i32
    %c0_i32_0 = arith.constant 0 : i32
    %c0_i32_1 = arith.constant 0 : i32
    return %c0_i32, %c0_i32_0 : i32, i32
  }
  func.func @transform_12(%arg0: i32) -> (i32, i32) {
    %c0_i32 = arith.constant 0 : i32
    %c0_i32_0 = arith.constant 0 : i32
    %c0_i32_1 = arith.constant 0 : i32
    return %c0_i32, %c0_i32_0 : i32, i32
  }
  func.func @transform_13(%arg0: i32) -> (i32, i32) {
    %c0_i32 = arith.constant 0 : i32
    %c0_i32_0 = arith.constant 0 : i32
    %c0_i32_1 = arith.constant 0 : i32
    return %c0_i32, %c0_i32_0 : i32, i32
  }
  func.func @transform_14(%arg0: i32) -> (i32, i32) {
    %c0_i32 = arith.constant 0 : i32
    %c0_i32_0 = arith.constant 0 : i32
    %c0_i32_1 = arith.constant 0 : i32
    return %c0_i32, %c0_i32_0 : i32, i32
  }
}

</mosaic_0001>

<bundles_post_ra>
// kernel: _lambda_.4
= control target key start
LH: loop header
LB: loop body
LE: loop exit
PB: predicated region body
PF: predicated region fallthrough
CT: control target
= control target key end

     0   :  { %8 = vsyncpa [#allocation3], 0  ;;  %s483_s12 = smov 0   ;;  %s525_s0 = inlined_call_operand.vmem [shape: bf16[8,2,64], index: 0, kind: input, shape index: {}]   ;;  %s526_s1 = inlined_call_operand.hbm [shape: bf16[64,256], index: 1, kind: input, shape index: {}]   ;;  %s527_s2 = inlined_call_operand.vmem [shape: f32[1,256], index: 2, kind: input, shape index: {}]   ;;  %s528_s3 = inlined_call_operand.vmem [shape: f32[8,2,256], index: 3, kind: output, shape index: {}]  }
   0x1 LB: > { %s489_s13 = sadd.s32 4294967295, %s457_s12   ;;  %p367_p0 = scmp.ge.s32.totalorder %s457_s12, 1  ;;  %s457_s12 = sphi %s483_s12, %s14_s12  }
   0x2   : > { %p113_p1 = scmp.lt.s32.totalorder %s457_s12, 9  ;;  %s459_s14 = smov [#allocation2]  }
   0x3   : > { %s125_s15 = sshll.u32 %s459_s14, 4  ;;  %p395_p3 = scmp.eq.s32.totalorder %s489_s13, 0  ;;  %s126_s15 = int_to_ptr.vmem [resolvable:$true] %s125_s15 }
   0x4   : > { %p493_p2 = pnand %p367_p0, %p113_p1  ;;  %s432_s17 = scalar_lea.vmem %s126_s15, 1024 }
   0x5   : > { %p433_p7 = scmp.ne.s32.totalorder %s126_s15, %s432_s17  ;;  %p440_p10 = scmp.lt.s32.totalorder %s126_s15, %s126_s15 }
   0x6   : > { %p391_p4 = pneg %p493_p2  ;;  %p441_p11 = scmp.lt.s32.totalorder %s432_s17, %s432_s17 }
   0x8   : > { %p392_p5 = pnand %p395_p3, %p391_p4  ;;  %p442_p12 = por %p441_p11, %p440_p10 }
   0xa   : > { %p423_p6 = pneg %p392_p5 }
   0xc   : > { %p435_p8 = pnand %p433_p7, %p423_p6 }
   0xe   : > { %p436_p9 = pneg %p435_p8 }
  0x10   : > { %p443_p13 = pnand %p442_p12, %p436_p9 }
  0x12   : > { %446 = shalt.err (!%p443_p13)
}
  0x13   : > { %s460_s18 = smov 128   ;;  %s461_s19 = smov 8  }
  0x14   : > { %394 = dma.hbm_to_vmem [thread:$0]  (!%p392_p5), %s526_s1, 1024, %s126_s15, [#allocation3], %s460_s18, %s460_s18, %s461_s19  }
  0x15   : > { %150 = sbr.rel (%p493_p2) target bundleno = 244 (0xf4), region = 32 }
  0x1a   : > { %452 = dma.done.wait (%p395_p3), [#allocation3], 1024  }
  0x1b   : > { %454 = vsyncadd (%p395_p3), [#allocation3], 4294966272  ;;  %v462_v0 = vmov 0   ;;  %v409_v1 = vld [vmem:[#allocation2 + $0x34] ss:$8 sps:$4 sm:$0xff]   ;;  %p172_p0 = scmp.lt.s32.totalorder %s489_s13, 7  ;;  %v277_v10 = vlaneseq }
  0x1c   : > { %267 = vmatprep.mubr.bf16.mxu0 %v462_v0  ;;  %v411_v2 = vld [vmem:[#allocation2 + $0x30] ss:$8 sps:$4 sm:$0xff]   ;;  %243 = vmatprep.subr.bf16.mxu0 %v409_v1  ;;  %v412_v3 = vld [vmem:[#allocation2 + $0x24] ss:$8 sps:$4 sm:$0xff]   ;;  %v414_v4 = vld [vmem:[#allocation2 + $0x20] ss:$8 sps:$4 sm:$0xff]  }
  0x1d   : > { %244 = vmatpush1.bf16.msra.mxu0 %v411_v2  ;;  %v415_v5 = vld [vmem:[#allocation2 + $0x14] ss:$8 sps:$4 sm:$0xff]   ;;  %v417_v6 = vld [vmem:[#allocation2 + $0x10] ss:$8 sps:$4 sm:$0xff]   ;;  %v418_v7 = vld [vmem:[#allocation2 + $0x4] ss:$8 sps:$4 sm:$0xff]  }
  0x1e   : > { %245 = vmatprep.subr.bf16.mxu0 %v412_v3  ;;  %s531_s13 = smov (!%p172_p0, %s489_s13), 7  ;;  %v420_v8 = vld [vmem:[#allocation2] ss:$8 sps:$4 sm:$0xff]   ;;  %vm231_vm0 = vcmask 523264   ;;  %v278_v11 = vshrl.u32 %v277_v10, 7 }
  0x1f   : > { %s174_s24 = scalar_lea.vmem %s525_s0, %s531_s13  ;;  %v181_v14 = vld [vmem:[%s527_s2] sm:$0x3]  ;;  %s386_s27 = sshll.u32 %s531_s13, 2 }
  0x20   : > { %v182_v9 = vld [vmem:[%s174_s24] sm:$0x1]  ;;  %v279_v12 = vsub.s32 0, %v278_v11  ;;  %v283_v13 = vsub.s32 1, %v278_v11  ;;  %s179_s30 = scalar_lea.vmem %s528_s3, %s386_s27 }
  0x21   : > { %246 = vmatpush1.bf16.msra.mxu0 %v414_v4 }
  0x22   : > { %247 = vmatprep.subr.bf16.mxu0 %v415_v5  ;;  %v280_v15 = vrot.slane %v181_v14, %v279_v12  ;;  %v284_v16 = vrot.slane %v181_v14, %v283_v13 }
  0x25   : > { %248 = vmatpush1.bf16.msra.mxu0 %v417_v6 }
  0x26   : > { %249 = vmatprep.subr.bf16.mxu0 %v418_v7 }
  0x29   : > { %250 = vmatpush1.bf16.msra.mxu0 %v420_v8 }
  0x2c   : > { %382 = vmatmul.mubr.msk.bf16.vlgmr.msra.gmra.mxu0 %vm231_vm0, %v182_v9 }
  0xec   : > { %v269_v17 = vpop.f32.mrf.mxu0 }
  0xed   : > { %v287_v19 = vadd.f32 %v280_v15, %v269_v17 }
  0xee   : > { %v271_v18 = vpop.f32.mrf.mxu0 }
  0xef   : > { %v288_v20 = vadd.f32 %v284_v16, %v271_v18 }
  0xf0   : > { %v273_v21 = vpop.f32.mrf.mxu0 }
  0xf1   : > { %v291_v22 = vcombine.low %v287_v19, %v288_v20 }
  0xf2   : > { %v274_v23 = vpop.f32.mrf.mxu0 }
  0xf3   : > { %383 = vst.sshfl [vmem:[%s179_s30] sm:$0x33 pattern:$0x76325410] %v291_v22 }
  0xf4 PF: > { %s14_s12 = sadd.s32 1, %s457_s12  }
  0xf5   : > { %p11_p1 = scmp.ge.s32.totalorder %s14_s12, 10  }
  0xf7   :  { %13 = sbr.rel (!%p11_p1) target bundleno = 1 (0x1), region = 67 }
  0xfc   :  { %322 = vsyncpa [#allocation3], 1 }
  0xfd   :  { %324 = vsyncpa [#allocation3 + $0x1], 1 }

// kernel: _lambda_.5
= control target key start
LH: loop header
LB: loop body
LE: loop exit
PB: predicated region body
PF: predicated region fallthrough
CT: control target
= control target key end

     0   :  { %s746_s18 = smov 0   ;;  %s841_s0 = inlined_call_operand.vmem [shape: f32[8,2,256], index: 0, kind: input, shape index: {}, may-alias: {0,1}]   ;;  %s842_s1 = inlined_call_operand.vmem [shape: f32[8,2,256], index: 1, kind: input, shape index: {}, may-alias: {0,1}]   ;;  %s843_s2 = inlined_call_operand.vmem [shape: bf16[128,128], index: 2, kind: input, shape index: {}]   ;;  %s844_s3 = inlined_call_operand.vmem [shape: bf16[128,128], index: 3, kind: input, shape index: {}]   ;;  %s845_s4 = inlined_call_operand.vmem [shape: bf16[8,2,128], index: 4, kind: output, shape index: {0}]   ;;  %s846_s5 = inlined_call_operand.vmem [shape: bf16[8,2,128], index: 5, kind: output, shape index: {1}]  }
   0x1 LB: > { %s589_s19 = sadd.s32 4294967295, %s711_s18   ;;  %p593_p0 = scmp.ge.s32.totalorder %s711_s18, 1  ;;  %s711_s18 = sphi %s746_s18, %s16_s18  }
   0x2   : > { %p207_p1 = scmp.lt.s32.totalorder %s711_s18, 9 }
   0x4   : > { %p208_p2 = pnand %p593_p0, %p207_p1 }
   0x5   : > { %p244_p3 = scmp.lt.s32.totalorder (!%p208_p2), %s589_s19, 7  ;;  %s249_s20 = ssub.s32 (!%p208_p2), 7, %s589_s19 }
   0x6   : > { %211 = sbr.rel (%p208_p2) target bundleno = 253 (0xfd), region = 36  ;;  %p250_p4 = scmp.lt.s32.totalorder (!%p208_p2), %s249_s20, 7 }
   0x7   : > { %p598_p5 = scmp.ne.s32.totalorder (!%p208_p2), %s589_s19, 0 }
   0xb   : > { %s754_s21 = scalar_select %p244_p3, %s589_s19, 7 }
   0xc   : > { %s848_s20 = smov (!%p250_p4, %s249_s20), 7  ;;  %269 = sbr.rel (%p598_p5) target bundleno = 19 (0x13), region = 40 }
   0xd   : > { %s618_s22 = sshll.u32 %s754_s21, 2  ;;  %s259_s25 = scalar_lea.vmem %s845_s4, %s754_s21 }
   0xe   : > { %s766_s28 = scalar_lea.vmem %s841_s0, %s618_s22  ;;  %s619_s29 = sshll.u32 %s848_s20, 2 }
   0xf   : > { %s772_s7 = scalar_lea.vmem %s842_s1, %s619_s29  ;;  %s263_s10 = scalar_lea.vmem %s846_s5, %s848_s20 }
  0x11   : > { %v713_v0 = vmov 0.0  }
  0x12   : > { %270 = vst [vmem:[#allocation2] sm:$0x3] %v713_v0  ;;  %271 = vst [vmem:[#allocation3] sm:$0x3] %v713_v0 }
  0x13 PF: > { %v689_v1 = vld [vmem:[%s843_s2 + $0x38] sm:$0xff]   ;;  %v714_v2 = vmov 0.0   ;;  %v691_v4 = vld [vmem:[%s843_s2 + $0x30] sm:$0xff]   ;;  %vm715_vm0 = vmmov 0   ;;  %v693_v6 = vld [vmem:[%s843_s2 + $0x28] sm:$0xff]  }
  0x14   : > { %638 = vmatprep.subr.bf16.mxu0 %v714_v2  ;;  %658 = vmatprep.subr.bf16.mxu1 %v714_v2  ;;  %v690_v3 = vld [vmem:[%s844_s3 + $0x38] sm:$0xff]   ;;  %v692_v5 = vld [vmem:[%s844_s3 + $0x30] sm:$0xff]   ;;  %v694_v7 = vld [vmem:[%s844_s3 + $0x28] sm:$0xff]  }
  0x15   : > { %639 = vmatpush3.bf16.msra.mxu0 %v689_v1  ;;  %654 = vmatprep.mubr.msk.bf16.mxu0 %vm715_vm0, %v714_v2  ;;  %v695_v8 = vld [vmem:[%s843_s2 + $0x20] sm:$0xff]   ;;  %v697_v10 = vld [vmem:[%s843_s2 + $0x18] sm:$0xff]   ;;  %v699_v12 = vld [vmem:[%s843_s2 + $0x10] sm:$0xff]  }
  0x16   : > { %659 = vmatpush3.bf16.msra.mxu1 %v690_v3  ;;  %640 = vmatprep.subr.bf16.mxu0 %v714_v2  ;;  %v696_v9 = vld [vmem:[%s844_s3 + $0x20] sm:$0xff]   ;;  %v698_v11 = vld [vmem:[%s844_s3 + $0x18] sm:$0xff]   ;;  %v700_v13 = vld [vmem:[%s844_s3 + $0x10] sm:$0xff]  }
  0x17   : > { %660 = vmatprep.subr.bf16.mxu1 %v714_v2  ;;  %674 = vmatprep.mubr.msk.bf16.mxu1 %vm715_vm0, %v714_v2  ;;  %v701_v14 = vld [vmem:[%s843_s2 + $0x8] sm:$0xff]   ;;  %v703_v16 = vld [vmem:[%s843_s2] sm:$0xff]  }
  0x18   : > { %v702_v15 = vld [vmem:[%s844_s3 + $0x8] sm:$0xff]   ;;  %v704_v18 = vld [vmem:[%s844_s3] sm:$0xff]  }
  0x19   : > { %641 = vmatpush3.bf16.msra.mxu0 %v691_v4  ;;  %v273_v17 = vld [vmem:[#allocation2] sm:$0x3]  ;;  %v382_v19 = vld [vmem:[#allocation3] sm:$0x3] }
  0x1a   : > { %661 = vmatpush3.bf16.msra.mxu1 %v692_v5  ;;  %642 = vmatprep.subr.bf16.mxu0 %v714_v2  ;;  %v274_v20 = vpack.c.bf16 %v273_v17, %v273_v17  ;;  %v383_v21 = vpack.c.bf16 %v382_v19, %v382_v19  ;;  %v272_v22 = vld [vmem:[%s766_s28] sm:$0x3]  ;;  %v607_v23 = vld [vmem:[%s772_s7 + $0x2] sm:$0x3] }
  0x1b   : > { %662 = vmatprep.subr.bf16.mxu1 %v714_v2 }
  0x1d   : > { %643 = vmatpush3.bf16.msra.mxu0 %v693_v6 }
  0x1e   : > { %663 = vmatpush3.bf16.msra.mxu1 %v694_v7  ;;  %644 = vmatprep.subr.bf16.mxu0 %v714_v2 }
  0x1f   : > { %664 = vmatprep.subr.bf16.mxu1 %v714_v2 }
  0x21   : > { %645 = vmatpush3.bf16.msra.mxu0 %v695_v8 }
  0x22   : > { %665 = vmatpush3.bf16.msra.mxu1 %v696_v9  ;;  %646 = vmatprep.subr.bf16.mxu0 %v714_v2 }
  0x23   : > { %666 = vmatprep.subr.bf16.mxu1 %v714_v2 }
  0x25   : > { %647 = vmatpush3.bf16.msra.mxu0 %v697_v10 }
  0x26   : > { %667 = vmatpush3.bf16.msra.mxu1 %v698_v11  ;;  %648 = vmatprep.subr.bf16.mxu0 %v714_v2 }
  0x27   : > { %668 = vmatprep.subr.bf16.mxu1 %v714_v2 }
  0x29   : > { %649 = vmatpush3.bf16.msra.mxu0 %v699_v12 }
  0x2a   : > { %669 = vmatpush3.bf16.msra.mxu1 %v700_v13  ;;  %650 = vmatprep.subr.bf16.mxu0 %v714_v2 }
  0x2b   : > { %670 = vmatprep.subr.bf16.mxu1 %v714_v2 }
  0x2d   : > { %651 = vmatpush3.bf16.msra.mxu0 %v701_v14 }
  0x2e   : > { %671 = vmatpush3.bf16.msra.mxu1 %v702_v15  ;;  %652 = vmatprep.subr.bf16.mxu0 %v714_v2 }
  0x2f   : > { %672 = vmatprep.subr.bf16.mxu1 %v714_v2 }
  0x31   : > { %653 = vmatpush3.bf16.msra.mxu0 %v703_v16 }
  0x32   : > { %673 = vmatpush3.bf16.msra.mxu1 %v704_v18 }
  0x34   : > { %655 = vmatmul.mubr.bf16.vlgmr.msra.gmra.mxu0 %v274_v20 }
  0x35   : > { %675 = vmatmul.mubr.bf16.vlgmr.msra.gmra.mxu1 %v383_v21 }
  0xf4   : > { %v373_v24 = vpop.f32.mrf.mxu0 }
  0xf5   : > { %v379_v25 = vadd.f32 %v373_v24, %v272_v22  ;;  %v482_v26 = vpop.f32.mrf.mxu1 }
  0xf6   : > { %v488_v27 = vadd.f32 %v607_v23, %v482_v26  ;;  %v656_v28 = vpop.f32.mrf.mxu0 }
  0xf7   : > { %v380_v29 = vmax.f32 %v379_v25, 0.0  ;;  %v676_v30 = vpop.f32.mrf.mxu1 }
  0xf8   : > { %v489_v31 = vmax.f32 %v488_v27, 0.0  ;;  %v376_v32 = vpop.f32.mrf.mxu0 }
  0xf9   : > { %490 = vst [vmem:[#allocation2] sm:$0x3] %v380_v29  ;;  %v492_v33 = vpack.c.bf16 %v380_v29, %v380_v29  ;;  %v485_v34 = vpop.f32.mrf.mxu1 }
  0xfa   : > { %491 = vst [vmem:[#allocation3] sm:$0x3] %v489_v31  ;;  %v494_v35 = vpack.c.bf16 %v489_v31, %v489_v31  ;;  %v657_v36 = vpop.f32.mrf.mxu0 }
  0xfb   : > { %493 = vst [vmem:[%s259_s25] sm:$0x1] %v492_v33  ;;  %v677_v37 = vpop.f32.mrf.mxu1 }
  0xfc   : > { %495 = vst [vmem:[%s263_s10] sm:$0x1] %v494_v35 }
  0xfd PF: > { %s16_s18 = sadd.s32 1, %s711_s18  }
  0xfe   : > { %p13_p6 = scmp.ge.s32.totalorder %s16_s18, 10  }
 0x100   :  { %15 = sbr.rel (!%p13_p6) target bundleno = 1 (0x1), region = 85 }

// kernel: _lambda_.6
= control target key start
LH: loop header
LB: loop body
LE: loop exit
PB: predicated region body
PF: predicated region fallthrough
CT: control target
= control target key end

     0   :  { %s660_s18 = smov 0   ;;  %s735_s0 = inlined_call_operand.vmem [shape: bf16[8,2,128], index: 0, kind: input, shape index: {}]   ;;  %s736_s1 = inlined_call_operand.vmem [shape: bf16[8,2,128], index: 1, kind: input, shape index: {}]   ;;  %s737_s2 = inlined_call_operand.vmem [shape: bf16[128,128], index: 2, kind: input, shape index: {}]   ;;  %s738_s3 = inlined_call_operand.vmem [shape: bf16[128,128], index: 3, kind: input, shape index: {}]   ;;  %s739_s4 = inlined_call_operand.vmem [shape: f32[1,128], index: 4, kind: input, shape index: {}]   ;;  %s740_s5 = inlined_call_operand.vmem [shape: f32[8,2,128], index: 5, kind: output, shape index: {}]  }
   0x1 LB: > { %s511_s19 = sadd.s32 4294967295, %s626_s18   ;;  %p515_p0 = scmp.ge.s32.totalorder %s626_s18, 1  ;;  %s626_s18 = sphi %s660_s18, %s15_s18  }
   0x2   : > { %p193_p1 = scmp.lt.s32.totalorder %s626_s18, 9 }
   0x4   : > { %p194_p2 = pnand %p515_p0, %p193_p1 }
   0x5   : > { %p221_p3 = scmp.lt.s32.totalorder (!%p194_p2), %s511_s19, 7 }
   0x6   : > { %197 = sbr.rel (%p194_p2) target bundleno = 244 (0xf4), region = 40 }
   0xb   : > { %v604_v0 = vld [vmem:[%s737_s2 + $0x38] sm:$0xff]   ;;  %v628_v1 = vmov 0.0   ;;  %v606_v3 = vld [vmem:[%s737_s2 + $0x30] sm:$0xff]   ;;  %vm629_vm0 = vmmov 0   ;;  %v608_v5 = vld [vmem:[%s737_s2 + $0x28] sm:$0xff]   ;;  %s742_s19 = smov (!%p221_p3, %s511_s19), 7 }
   0xc   : > { %554 = vmatprep.subr.bf16.mxu0 %v628_v1  ;;  %574 = vmatprep.subr.bf16.mxu1 %v628_v1  ;;  %v605_v2 = vld [vmem:[%s738_s3 + $0x38] sm:$0xff]   ;;  %v607_v4 = vld [vmem:[%s738_s3 + $0x30] sm:$0xff]   ;;  %v609_v6 = vld [vmem:[%s738_s3 + $0x28] sm:$0xff]   ;;  %s223_s6 = scalar_lea.vmem %s735_s0, %s742_s19  ;;  %s226_s9 = scalar_lea.vmem %s736_s1, %s742_s19 }
   0xd   : > { %555 = vmatpush3.bf16.msra.mxu0 %v604_v0  ;;  %570 = vmatprep.mubr.msk.bf16.mxu0 %vm629_vm0, %v628_v1  ;;  %v610_v7 = vld [vmem:[%s737_s2 + $0x20] sm:$0xff]   ;;  %v612_v9 = vld [vmem:[%s737_s2 + $0x18] sm:$0xff]   ;;  %v614_v11 = vld [vmem:[%s737_s2 + $0x10] sm:$0xff]   ;;  %s516_s12 = sshll.u32 %s742_s19, 1 }
   0xe   : > { %575 = vmatpush3.bf16.msra.mxu1 %v605_v2  ;;  %556 = vmatprep.subr.bf16.mxu0 %v628_v1  ;;  %v611_v8 = vld [vmem:[%s738_s3 + $0x20] sm:$0xff]   ;;  %v613_v10 = vld [vmem:[%s738_s3 + $0x18] sm:$0xff]   ;;  %v615_v12 = vld [vmem:[%s738_s3 + $0x10] sm:$0xff]   ;;  %s230_s15 = scalar_lea.vmem %s740_s5, %s516_s12 }
   0xf   : > { %576 = vmatprep.subr.bf16.mxu1 %v628_v1  ;;  %590 = vmatprep.mubr.msk.bf16.mxu1 %vm629_vm0, %v628_v1  ;;  %v616_v13 = vld [vmem:[%s737_s2 + $0x8] sm:$0xff]   ;;  %v618_v15 = vld [vmem:[%s737_s2] sm:$0xff]  }
  0x10   : > { %v617_v14 = vld [vmem:[%s738_s3 + $0x8] sm:$0xff]   ;;  %v619_v16 = vld [vmem:[%s738_s3] sm:$0xff]  }
  0x11   : > { %557 = vmatpush3.bf16.msra.mxu0 %v606_v3  ;;  %v233_v17 = vld [vmem:[%s223_s6] sm:$0x1] }
  0x12   : > { %577 = vmatpush3.bf16.msra.mxu1 %v607_v4  ;;  %558 = vmatprep.subr.bf16.mxu0 %v628_v1  ;;  %v345_v18 = vld [vmem:[%s226_s9] sm:$0x1] }
  0x13   : > { %578 = vmatprep.subr.bf16.mxu1 %v628_v1  ;;  %v525_v19 = vld [vmem:[%s739_s4] ss:$0 sm:$0xff] }
  0x15   : > { %559 = vmatpush3.bf16.msra.mxu0 %v608_v5 }
  0x16   : > { %579 = vmatpush3.bf16.msra.mxu1 %v609_v6  ;;  %560 = vmatprep.subr.bf16.mxu0 %v628_v1 }
  0x17   : > { %580 = vmatprep.subr.bf16.mxu1 %v628_v1 }
  0x19   : > { %561 = vmatpush3.bf16.msra.mxu0 %v610_v7 }
  0x1a   : > { %581 = vmatpush3.bf16.msra.mxu1 %v611_v8  ;;  %562 = vmatprep.subr.bf16.mxu0 %v628_v1 }
  0x1b   : > { %582 = vmatprep.subr.bf16.mxu1 %v628_v1 }
  0x1d   : > { %563 = vmatpush3.bf16.msra.mxu0 %v612_v9 }
  0x1e   : > { %583 = vmatpush3.bf16.msra.mxu1 %v613_v10  ;;  %564 = vmatprep.subr.bf16.mxu0 %v628_v1 }
  0x1f   : > { %584 = vmatprep.subr.bf16.mxu1 %v628_v1 }
  0x21   : > { %565 = vmatpush3.bf16.msra.mxu0 %v614_v11 }
  0x22   : > { %585 = vmatpush3.bf16.msra.mxu1 %v615_v12  ;;  %566 = vmatprep.subr.bf16.mxu0 %v628_v1 }
  0x23   : > { %586 = vmatprep.subr.bf16.mxu1 %v628_v1 }
  0x25   : > { %567 = vmatpush3.bf16.msra.mxu0 %v616_v13 }
  0x26   : > { %587 = vmatpush3.bf16.msra.mxu1 %v617_v14  ;;  %568 = vmatprep.subr.bf16.mxu0 %v628_v1 }
  0x27   : > { %588 = vmatprep.subr.bf16.mxu1 %v628_v1 }
  0x29   : > { %569 = vmatpush3.bf16.msra.mxu0 %v618_v15 }
  0x2a   : > { %589 = vmatpush3.bf16.msra.mxu1 %v619_v16 }
  0x2c   : > { %571 = vmatmul.mubr.bf16.vlgmr.msra.gmra.mxu0 %v233_v17 }
  0x2d   : > { %591 = vmatmul.mubr.bf16.vlgmr.msra.gmra.mxu1 %v345_v18 }
  0xec   : > { %v332_v20 = vpop.f32.mrf.mxu0 }
  0xed   : > { %v344_v21 = vadd.f32 %v525_v19, %v332_v20  ;;  %v444_v22 = vpop.f32.mrf.mxu1 }
  0xee   : > { %v572_v23 = vpop.f32.mrf.mxu0 }
  0xef   : > { %v450_v24 = vadd.f32 %v444_v22, %v344_v21  ;;  %v592_v25 = vpop.f32.mrf.mxu1 }
  0xf0   : > { %v335_v26 = vpop.f32.mrf.mxu0 }
  0xf1   : > { %451 = vst [vmem:[%s230_s15] sm:$0x3] %v450_v24  ;;  %v447_v27 = vpop.f32.mrf.mxu1 }
  0xf2   : > { %v573_v28 = vpop.f32.mrf.mxu0 }
  0xf3   : > { %v593_v29 = vpop.f32.mrf.mxu1 }
  0xf4 PF: > { %s15_s18 = sadd.s32 1, %s626_s18  }
  0xf5   : > { %p12_p4 = scmp.ge.s32.totalorder %s15_s18, 10  }
  0xf7   :  { %14 = sbr.rel (!%p12_p4) target bundleno = 1 (0x1), region = 73 }

// kernel: _lambda_.7
= control target key start
LH: loop header
LB: loop body
LE: loop exit
PB: predicated region body
PF: predicated region fallthrough
CT: control target
= control target key end

     0   :  { %20 = vsyncpa [#allocation6], 0  ;;  %s2125_s0 = inlined_call_operand.vmem [shape: f32[8,2,128], index: 0, kind: input, shape index: {}]   ;;  %s2126_s1 = inlined_call_operand.vmem [shape: bf16[8,2,128], index: 1, kind: input, shape index: {}]   ;;  %s2127_s2 = inlined_call_operand.vmem [shape: bf16[8,2,128], index: 2, kind: input, shape index: {}]   ;;  %s2128_s3 = inlined_call_operand.vmem [shape: bf16[128,128], index: 3, kind: input, shape index: {}]   ;;  %s2129_s4 = inlined_call_operand.vmem [shape: bf16[128,128], index: 4, kind: input, shape index: {}]   ;;  %s2130_s5 = inlined_call_operand.vmem [shape: f32[1,128], index: 5, kind: input, shape index: {}]   ;;  %s2131_s6 = inlined_call_operand.vmem [shape: bf16[128,128], index: 6, kind: input, shape index: {}]   ;;  %s2132_s7 = inlined_call_operand.vmem [shape: bf16[128,32], index: 7, kind: input, shape index: {}]   ;;  %s2133_s8 = inlined_call_operand.vmem [shape: bf16[128,32], index: 8, kind: input, shape index: {}]   ;;  %s2134_s9 = inlined_call_operand.vmem [shape: f32[1,32], index: 9, kind: input, shape index: {}]   ;;  %s2135_s10 = inlined_call_operand.vmem [shape: bf16[128,32], index: 10, kind: input, shape index: {}]   ;;  %s2136_s11 = inlined_call_operand.vmem [shape: bf16[128,32], index: 11, kind: input, shape index: {}]   ;;  %s2137_s12 = inlined_call_operand.vmem [shape: f32[1,32], index: 12, kind: input, shape index: {}]   ;;  %s2138_s13 = inlined_call_operand.hbm [shape: f32[2,32], index: 13, kind: output, shape index: {0}]   ;;  %s2139_s14 = inlined_call_operand.hbm [shape: f32[2,32], index: 14, kind: output, shape index: {1}]  }
   0x1   :  { %21 = vsyncpa [#allocation8], 0  ;;  %s1853_s29 = smov 0  }
   0x2 LB: > { %s1859_s30 = sadd.s32 4294967295, %s1768_s29   ;;  %p1344_p0 = scmp.ge.s32.totalorder %s1768_s29, 1  ;;  %s1768_s29 = sphi %s1853_s29, %s27_s29  }
   0x3   : > { %p408_p1 = scmp.lt.s32.totalorder %s1768_s29, 9 }
   0x5   : > { %p409_p2 = pnand %p1344_p0, %p408_p1 }
   0x6   : > { %p450_p3 = scmp.lt.s32.totalorder (!%p409_p2), %s1859_s30, 7  ;;  %p1346_p4 = scmp.ne.s32.totalorder (!%p409_p2), %s1859_s30, 0 }
   0x7   : > { %412 = sbr.rel (%p409_p2) target bundleno = 984 (0x3d8), region = 72 }
   0xc   : > { %s451_s15 = scalar_select %p450_p3, %s1859_s30, 7 }
   0xd   : > { %460 = sbr.rel (%p1346_p4) target bundleno = 452 (0x1c4), region = 76 }
   0xe   : > { %s1345_s16 = sshll.u32 %s451_s15, 1 }
   0xf   : > { %s1868_s19 = scalar_lea.vmem %s2125_s0, %s1345_s16 }
  0x12   : > { %v1646_v0 = vld [vmem:[%s2129_s4 + $0x38] sm:$0xff]   ;;  %v1770_v1 = vmov 0.0   ;;  %v1648_v3 = vld [vmem:[%s2129_s4 + $0x30] sm:$0xff]   ;;  %vm1771_vm0 = vmmov 0   ;;  %v1650_v5 = vld [vmem:[%s2129_s4 + $0x28] sm:$0xff]   ;;  %vm793_vm1 = vcmask 254976  }
  0x13   : > { %461 = vst [vmem:[#allocation2] sm:$0x3] %v1770_v1  ;;  %1478 = vmatprep.subr.bf16.mxu0 %v1770_v1  ;;  %1498 = vmatprep.subr.bf16.mxu1 %v1770_v1  ;;  %v1647_v2 = vld [vmem:[%s2128_s3 + $0x38] sm:$0xff]   ;;  %v1649_v4 = vld [vmem:[%s2128_s3 + $0x30] sm:$0xff]   ;;  %v1651_v6 = vld [vmem:[%s2128_s3 + $0x28] sm:$0xff]  }
  0x14   : > { %1479 = vmatpush3.bf16.msra.mxu0 %v1646_v0  ;;  %1494 = vmatprep.mubr.msk.bf16.mxu0 %vm1771_vm0, %v1770_v1  ;;  %v1652_v7 = vld [vmem:[%s2129_s4 + $0x20] sm:$0xff]   ;;  %v1654_v9 = vld [vmem:[%s2129_s4 + $0x18] sm:$0xff]   ;;  %v1656_v11 = vld [vmem:[%s2129_s4 + $0x10] sm:$0xff]  }
  0x15   : > { %1499 = vmatpush3.bf16.msra.mxu1 %v1647_v2  ;;  %1480 = vmatprep.subr.bf16.mxu0 %v1770_v1  ;;  %v1653_v8 = vld [vmem:[%s2128_s3 + $0x20] sm:$0xff]   ;;  %v1655_v10 = vld [vmem:[%s2128_s3 + $0x18] sm:$0xff]   ;;  %v1657_v12 = vld [vmem:[%s2128_s3 + $0x10] sm:$0xff]  }
  0x16   : > { %1500 = vmatprep.subr.bf16.mxu1 %v1770_v1  ;;  %1514 = vmatprep.mubr.msk.bf16.mxu1 %vm1771_vm0, %v1770_v1  ;;  %v1658_v13 = vld [vmem:[%s2129_s4 + $0x8] sm:$0xff]   ;;  %v1660_v15 = vld [vmem:[%s2129_s4] sm:$0xff]   ;;  %v1662_v18 = vld [vmem:[%s2133_s8 + $0x38] sm:$0xff]  }
  0x17   : > { %v1659_v14 = vld [vmem:[%s2128_s3 + $0x8] sm:$0xff]   ;;  %v1661_v16 = vld [vmem:[%s2128_s3] sm:$0xff]   ;;  %v1663_v20 = vld [vmem:[%s2136_s11 + $0x38] sm:$0xff]  }
  0x18   : > { %1481 = vmatpush3.bf16.msra.mxu0 %v1648_v3  ;;  %v1348_v17 = vld [vmem:[%s2127_s2 + $0x7] sm:$0x1]  ;;  %v1664_v21 = vld [vmem:[%s2133_s8 + $0x30] sm:$0xff]   ;;  %v1666_v23 = vld [vmem:[%s2133_s8 + $0x28] sm:$0xff]  }
  0x19   : > { %1501 = vmatpush3.bf16.msra.mxu1 %v1649_v4  ;;  %1482 = vmatprep.subr.bf16.mxu0 %v1770_v1  ;;  %v1347_v19 = vld [vmem:[%s2126_s1 + $0x7] sm:$0x1]  ;;  %v1665_v22 = vld [vmem:[%s2136_s11 + $0x30] sm:$0xff]   ;;  %v1667_v24 = vld [vmem:[%s2136_s11 + $0x28] sm:$0xff]  }
  0x1a   : > { %1502 = vmatprep.subr.bf16.mxu1 %v1770_v1  ;;  %v1668_v25 = vld [vmem:[%s2133_s8 + $0x20] sm:$0xff]   ;;  %v1670_v27 = vld [vmem:[%s2133_s8 + $0x18] sm:$0xff]   ;;  %v1672_v29 = vld [vmem:[%s2133_s8 + $0x10] sm:$0xff]  }
  0x1b   : > { %v1669_v26 = vld [vmem:[%s2136_s11 + $0x20] sm:$0xff]   ;;  %v1671_v28 = vld [vmem:[%s2136_s11 + $0x18] sm:$0xff]   ;;  %v1673_v30 = vld [vmem:[%s2136_s11 + $0x10] sm:$0xff]  }
  0x1c   : > { %1483 = vmatpush3.bf16.msra.mxu0 %v1650_v5  ;;  %v1674_v31 = vld [vmem:[%s2133_s8 + $0x8] sm:$0xff]   ;;  %v1676_v33 = vld [vmem:[%s2133_s8] sm:$0xff]  }
  0x1d   : > { %1503 = vmatpush3.bf16.msra.mxu1 %v1651_v6  ;;  %1484 = vmatprep.subr.bf16.mxu0 %v1770_v1  ;;  %v1675_v32 = vld [vmem:[%s2136_s11 + $0x8] sm:$0xff]   ;;  %v1677_v34 = vld [vmem:[%s2136_s11] sm:$0xff]  }
  0x1e   : > { %1504 = vmatprep.subr.bf16.mxu1 %v1770_v1  ;;  %v1365_v37 = vld [vmem:[%s2130_s5] ss:$0 sm:$0xff] }
  0x1f   : > { %v1366_v48 = vld [vmem:[%s2134_s9] ss:$0 sm:$0xff] }
  0x20   : > { %1485 = vmatpush3.bf16.msra.mxu0 %v1652_v7  ;;  %v1375_v49 = vld [vmem:[%s2137_s12] ss:$0 sm:$0xff] }
  0x21   : > { %1505 = vmatpush3.bf16.msra.mxu1 %v1653_v8  ;;  %1486 = vmatprep.subr.bf16.mxu0 %v1770_v1 }
  0x22   : > { %1506 = vmatprep.subr.bf16.mxu1 %v1770_v1 }
  0x24   : > { %1487 = vmatpush3.bf16.msra.mxu0 %v1654_v9 }
  0x25   : > { %1507 = vmatpush3.bf16.msra.mxu1 %v1655_v10  ;;  %1488 = vmatprep.subr.bf16.mxu0 %v1770_v1 }
  0x26   : > { %1508 = vmatprep.subr.bf16.mxu1 %v1770_v1 }
  0x28   : > { %1489 = vmatpush3.bf16.msra.mxu0 %v1656_v11 }
  0x29   : > { %1509 = vmatpush3.bf16.msra.mxu1 %v1657_v12  ;;  %1490 = vmatprep.subr.bf16.mxu0 %v1770_v1 }
  0x2a   : > { %1510 = vmatprep.subr.bf16.mxu1 %v1770_v1 }
  0x2c   : > { %1491 = vmatpush3.bf16.msra.mxu0 %v1658_v13 }
  0x2d   : > { %1511 = vmatpush3.bf16.msra.mxu1 %v1659_v14  ;;  %1492 = vmatprep.subr.bf16.mxu0 %v1770_v1 }
  0x2e   : > { %1512 = vmatprep.subr.bf16.mxu1 %v1770_v1 }
  0x30   : > { %1493 = vmatpush3.bf16.msra.mxu0 %v1660_v15 }
  0x31   : > { %1513 = vmatpush3.bf16.msra.mxu1 %v1661_v16  ;;  %1518 = vmatprep.subr.bf16.mxu0 %v1770_v1 }
  0x32   : > { %1538 = vmatprep.subr.bf16.mxu1 %v1770_v1 }
  0x33   : > { %1495 = vmatmul.mubr.bf16.vlgmr.msra.gmra.mxu0 %v1348_v17 }
  0x34   : > { %1515 = vmatmul.mubr.bf16.vlgmr.msra.gmra.mxu1 %v1347_v19  ;;  %1519 = vmatpush3.bf16.msra.mxu0 %v1662_v18 }
  0x35   : > { %1539 = vmatpush3.bf16.msra.mxu1 %v1663_v20  ;;  %1520 = vmatprep.subr.bf16.mxu0 %v1770_v1 }
  0x36   : > { %1540 = vmatprep.subr.bf16.mxu1 %v1770_v1  ;;  %1534 = vmatprep.mubr.msk.bf16.mxu0 %vm1771_vm0, %v1770_v1 }
  0x37   : > { %1554 = vmatprep.mubr.msk.bf16.mxu1 %vm1771_vm0, %v1770_v1 }
  0x38   : > { %1521 = vmatpush3.bf16.msra.mxu0 %v1664_v21 }
  0x39   : > { %1541 = vmatpush3.bf16.msra.mxu1 %v1665_v22  ;;  %1522 = vmatprep.subr.bf16.mxu0 %v1770_v1 }
  0x3a   : > { %1542 = vmatprep.subr.bf16.mxu1 %v1770_v1 }
  0x3c   : > { %1523 = vmatpush3.bf16.msra.mxu0 %v1666_v23 }
  0x3d   : > { %1543 = vmatpush3.bf16.msra.mxu1 %v1667_v24  ;;  %1524 = vmatprep.subr.bf16.mxu0 %v1770_v1 }
  0x3e   : > { %1544 = vmatprep.subr.bf16.mxu1 %v1770_v1 }
  0x40   : > { %1525 = vmatpush3.bf16.msra.mxu0 %v1668_v25 }
  0x41   : > { %1545 = vmatpush3.bf16.msra.mxu1 %v1669_v26  ;;  %1526 = vmatprep.subr.bf16.mxu0 %v1770_v1 }
  0x42   : > { %1546 = vmatprep.subr.bf16.mxu1 %v1770_v1 }
  0x44   : > { %1527 = vmatpush3.bf16.msra.mxu0 %v1670_v27 }
  0x45   : > { %1547 = vmatpush3.bf16.msra.mxu1 %v1671_v28  ;;  %1528 = vmatprep.subr.bf16.mxu0 %v1770_v1 }
  0x46   : > { %1548 = vmatprep.subr.bf16.mxu1 %v1770_v1 }
  0x48   : > { %1529 = vmatpush3.bf16.msra.mxu0 %v1672_v29 }
  0x49   : > { %1549 = vmatpush3.bf16.msra.mxu1 %v1673_v30  ;;  %1530 = vmatprep.subr.bf16.mxu0 %v1770_v1 }
  0x4a   : > { %1550 = vmatprep.subr.bf16.mxu1 %v1770_v1 }
  0x4c   : > { %1531 = vmatpush3.bf16.msra.mxu0 %v1674_v31 }
  0x4d   : > { %1551 = vmatpush3.bf16.msra.mxu1 %v1675_v32  ;;  %1532 = vmatprep.subr.bf16.mxu0 %v1770_v1 }
  0x4e   : > { %1552 = vmatprep.subr.bf16.mxu1 %v1770_v1 }
  0x50   : > { %1533 = vmatpush3.bf16.msra.mxu0 %v1676_v33 }
  0x51   : > { %1553 = vmatpush3.bf16.msra.mxu1 %v1677_v34 }
  0xf3   : > { %v578_v35 = vpop.f32.mrf.mxu0 }
  0xf4   : > { %v666_v36 = vpop.f32.mrf.mxu1 }
  0xf5   : > { %v667_v38 = vadd.f32 %v666_v36, %v578_v35  ;;  %v1496_v39 = vpop.f32.mrf.mxu0 }
  0xf6   : > { %v1516_v40 = vpop.f32.mrf.mxu1 }
  0xf7   : > { %v679_v41 = vadd.f32 %v1365_v37, %v667_v38  ;;  %v581_v42 = vpop.f32.mrf.mxu0 }
  0xf8   : > { %v669_v43 = vpop.f32.mrf.mxu1 }
  0xf9   : > { %v680_v44 = vmax.f32 %v679_v41, 0.0  ;;  %v1497_v45 = vpop.f32.mrf.mxu0 }
  0xfa   : > { %v1517_v46 = vpop.f32.mrf.mxu1 }
  0xfb   : > { %v681_v47 = vpack.c.bf16 %v680_v44, %v680_v44 }
  0xfd   : > { %1535 = vmatmul.mubr.bf16.vlgmr.msra.gmra.mxu0 %v681_v47  ;;  %1555 = vmatmul.mubr.bf16.vlgmr.msra.gmra.mxu1 %v681_v47 }
 0x1bd   : > { %v787_v50 = vpop.f32.mrf.mxu0  ;;  %v900_v51 = vpop.f32.mrf.mxu1 }
 0x1be   : > { %v788_v52 = vadd.f32 %v1366_v48, %v787_v50  ;;  %v901_v53 = vadd.f32 %v1375_v49, %v900_v51 }
 0x1bf   : > { %v1536_v54 = vpop.f32.mrf.mxu0  ;;  %v1556_v55 = vpop.f32.mrf.mxu1 }
 0x1c0   : > { %794 = vst.msk [vmem:[#allocation3] sm:$0x3] %vm793_vm1, %v788_v52  ;;  %906 = vst.msk [vmem:[#allocation4] sm:$0x3] %vm793_vm1, %v901_v53 }
 0x1c1   : > { %v790_v56 = vpop.f32.mrf.mxu0  ;;  %v903_v57 = vpop.f32.mrf.mxu1 }
 0x1c3   : > { %v1537_v58 = vpop.f32.mrf.mxu0  ;;  %v1557_v59 = vpop.f32.mrf.mxu1 }
 0x1c4 PF: > { %v1678_v60 = vld [vmem:[%s2131_s6 + $0x38] sm:$0xff]   ;;  %v1772_v61 = vmov 0.0   ;;  %v1679_v62 = vld [vmem:[%s2131_s6 + $0x30] sm:$0xff]   ;;  %vm1773_vm2 = vmmov 0   ;;  %v1680_v63 = vld [vmem:[%s2131_s6 + $0x28] sm:$0xff]   ;;  %p1392_p5 = scmp.ne.s32.totalorder %s1859_s30, 7 }
 0x1c5   : > { %1558 = vmatprep.subr.bf16.mxu0 %v1772_v61  ;;  %1574 = vmatprep.mubr.msk.bf16.mxu0 %vm1773_vm2, %v1772_v61  ;;  %v1681_v0 = vld [vmem:[%s2131_s6 + $0x20] sm:$0xff]   ;;  %v1682_v1 = vld [vmem:[%s2131_s6 + $0x18] sm:$0xff]   ;;  %v1683_v2 = vld [vmem:[%s2131_s6 + $0x10] sm:$0xff]  }
 0x1c6   : > { %1559 = vmatpush3.bf16.msra.mxu0 %v1678_v60  ;;  %v1684_v3 = vld [vmem:[%s2131_s6 + $0x8] sm:$0xff]   ;;  %v1685_v4 = vld [vmem:[%s2131_s6] sm:$0xff]  }
 0x1c7   : > { %1560 = vmatprep.subr.bf16.mxu0 %v1772_v61  ;;  %v908_v5 = vld [vmem:[#allocation2] sm:$0x3] }
 0x1c8   : > { %v909_v6 = vpack.c.bf16 %v908_v5, %v908_v5  ;;  %v907_v7 = vld [vmem:[%s1868_s19] sm:$0x3] }
 0x1ca   : > { %1561 = vmatpush3.bf16.msra.mxu0 %v1679_v62 }
 0x1cb   : > { %1562 = vmatprep.subr.bf16.mxu0 %v1772_v61 }
 0x1ce   : > { %1563 = vmatpush3.bf16.msra.mxu0 %v1680_v63 }
 0x1cf   : > { %1564 = vmatprep.subr.bf16.mxu0 %v1772_v61 }
 0x1d2   : > { %1565 = vmatpush3.bf16.msra.mxu0 %v1681_v0 }
 0x1d3   : > { %1566 = vmatprep.subr.bf16.mxu0 %v1772_v61 }
 0x1d6   : > { %1567 = vmatpush3.bf16.msra.mxu0 %v1682_v1 }
 0x1d7   : > { %1568 = vmatprep.subr.bf16.mxu0 %v1772_v61 }
 0x1da   : > { %1569 = vmatpush3.bf16.msra.mxu0 %v1683_v2 }
 0x1db   : > { %1570 = vmatprep.subr.bf16.mxu0 %v1772_v61 }
 0x1de   : > { %1571 = vmatpush3.bf16.msra.mxu0 %v1684_v3 }
 0x1df   : > { %1572 = vmatprep.subr.bf16.mxu0 %v1772_v61 }
 0x1e2   : > { %1573 = vmatpush3.bf16.msra.mxu0 %v1685_v4 }
 0x1e5   : > { %1575 = vmatmul.mubr.bf16.vlgmr.msra.gmra.mxu0 %v909_v6 }
 0x2a5   : > { %v1008_v8 = vpop.f32.mrf.mxu0 }
 0x2a6   : > { %v1014_v9 = vadd.f32 %v1008_v8, %v907_v7 }
 0x2a7   : > { %v1576_v10 = vpop.f32.mrf.mxu0  ;;  %1020 = sbr.rel (%p1392_p5) target bundleno = 956 (0x3bc), region = 80 }
 0x2a8   : > { %v1015_v11 = vmax.f32 %v1014_v9, 0.0 }
 0x2a9   : > { %v1011_v12 = vpop.f32.mrf.mxu0 }
 0x2aa   : > { %1016 = vst [vmem:[#allocation2] sm:$0x3] %v1015_v11 }
 0x2ab   : > { %v1577_v13 = vpop.f32.mrf.mxu0 }
 0x2ac   : > { %v1686_v14 = vld [vmem:[%s2135_s10 + $0x38] sm:$0xff]   ;;  %v1774_v15 = vmov 0.0   ;;  %v1687_v16 = vld [vmem:[%s2135_s10 + $0x30] sm:$0xff]   ;;  %vm1775_vm3 = vmmov 0   ;;  %v1688_v17 = vld [vmem:[%s2135_s10 + $0x28] sm:$0xff]   ;;  %v1021_v29 = vpack.c.bf16 %v1015_v11, %v1015_v11  ;;  %vm1128_vm4 = vcmask 254976  }
 0x2ad   : > { %1598 = vmatprep.subr.bf16.mxu1 %v1774_v15  ;;  %1578 = vmatprep.subr.bf16.mxu0 %v1774_v15  ;;  %v1694_v18 = vld [vmem:[%s2132_s7 + $0x38] sm:$0xff]   ;;  %v1689_v19 = vld [vmem:[%s2135_s10 + $0x20] sm:$0xff]   ;;  %v1695_v20 = vld [vmem:[%s2132_s7 + $0x30] sm:$0xff]  }
 0x2ae   : > { %1599 = vmatpush3.bf16.msra.mxu1 %v1686_v14  ;;  %1614 = vmatprep.mubr.msk.bf16.mxu1 %vm1775_vm3, %v1774_v15  ;;  %v1690_v21 = vld [vmem:[%s2135_s10 + $0x18] sm:$0xff]   ;;  %v1696_v22 = vld [vmem:[%s2132_s7 + $0x28] sm:$0xff]   ;;  %v1691_v23 = vld [vmem:[%s2135_s10 + $0x10] sm:$0xff]  }
 0x2af   : > { %1600 = vmatprep.subr.bf16.mxu1 %v1774_v15  ;;  %1594 = vmatprep.mubr.msk.bf16.mxu0 %vm1775_vm3, %v1774_v15  ;;  %v1697_v24 = vld [vmem:[%s2132_s7 + $0x20] sm:$0xff]   ;;  %v1692_v25 = vld [vmem:[%s2135_s10 + $0x8] sm:$0xff]   ;;  %v1698_v26 = vld [vmem:[%s2132_s7 + $0x18] sm:$0xff]  }
 0x2b0   : > { %1579 = vmatpush3.bf16.msra.mxu0 %v1694_v18  ;;  %v1693_v27 = vld [vmem:[%s2135_s10] sm:$0xff]   ;;  %v1699_v28 = vld [vmem:[%s2132_s7 + $0x10] sm:$0xff]   ;;  %v1700_v30 = vld [vmem:[%s2132_s7 + $0x8] sm:$0xff]  }
 0x2b1   : > { %1580 = vmatprep.subr.bf16.mxu0 %v1774_v15  ;;  %v1701_v31 = vld [vmem:[%s2132_s7] sm:$0xff]  }
 0x2b2   : > { %1601 = vmatpush3.bf16.msra.mxu1 %v1687_v16  ;;  %v1130_v32 = vld [vmem:[#allocation4] sm:$0x3]  ;;  %v1022_v40 = vld [vmem:[#allocation3] sm:$0x3] }
 0x2b3   : > { %1602 = vmatprep.subr.bf16.mxu1 %v1774_v15 }
 0x2b4   : > { %1581 = vmatpush3.bf16.msra.mxu0 %v1695_v20 }
 0x2b5   : > { %1582 = vmatprep.subr.bf16.mxu0 %v1774_v15 }
 0x2b6   : > { %1603 = vmatpush3.bf16.msra.mxu1 %v1688_v17 }
 0x2b7   : > { %1604 = vmatprep.subr.bf16.mxu1 %v1774_v15 }
 0x2b8   : > { %1583 = vmatpush3.bf16.msra.mxu0 %v1696_v22 }
 0x2b9   : > { %1584 = vmatprep.subr.bf16.mxu0 %v1774_v15 }
 0x2ba   : > { %1605 = vmatpush3.bf16.msra.mxu1 %v1689_v19 }
 0x2bb   : > { %1606 = vmatprep.subr.bf16.mxu1 %v1774_v15 }
 0x2bc   : > { %1585 = vmatpush3.bf16.msra.mxu0 %v1697_v24 }
 0x2bd   : > { %1586 = vmatprep.subr.bf16.mxu0 %v1774_v15 }
 0x2be   : > { %1607 = vmatpush3.bf16.msra.mxu1 %v1690_v21 }
 0x2bf   : > { %1608 = vmatprep.subr.bf16.mxu1 %v1774_v15 }
 0x2c0   : > { %1587 = vmatpush3.bf16.msra.mxu0 %v1698_v26 }
 0x2c1   : > { %1588 = vmatprep.subr.bf16.mxu0 %v1774_v15 }
 0x2c2   : > { %1609 = vmatpush3.bf16.msra.mxu1 %v1691_v23 }
 0x2c3   : > { %1610 = vmatprep.subr.bf16.mxu1 %v1774_v15 }
 0x2c4   : > { %1589 = vmatpush3.bf16.msra.mxu0 %v1699_v28 }
 0x2c5   : > { %1590 = vmatprep.subr.bf16.mxu0 %v1774_v15 }
 0x2c6   : > { %1611 = vmatpush3.bf16.msra.mxu1 %v1692_v25 }
 0x2c7   : > { %1612 = vmatprep.subr.bf16.mxu1 %v1774_v15 }
 0x2c8   : > { %1591 = vmatpush3.bf16.msra.mxu0 %v1700_v30 }
 0x2c9   : > { %1592 = vmatprep.subr.bf16.mxu0 %v1774_v15 }
 0x2ca   : > { %1613 = vmatpush3.bf16.msra.mxu1 %v1693_v27 }
 0x2cc   : > { %1593 = vmatpush3.bf16.msra.mxu0 %v1701_v31 }
 0x2cd   : > { %1615 = vmatmul.mubr.bf16.vlgmr.msra.gmra.mxu1 %v1021_v29 }
 0x2cf   : > { %1595 = vmatmul.mubr.bf16.vlgmr.msra.gmra.mxu0 %v1021_v29 }
 0x38d   : > { %v1229_v33 = vpop.f32.mrf.mxu1 }
 0x38e   : > { %v1235_v34 = vadd.f32 %v1229_v33, %v1130_v32 }
 0x38f   : > { %v1616_v35 = vpop.f32.mrf.mxu1  ;;  %v1121_v42 = vpop.f32.mrf.mxu0 }
 0x390   : > { %v1237_v36 = vand.u32 2147483647, %v1235_v34  ;;  %v1127_v43 = vadd.f32 %v1121_v42, %v1022_v40  ;;  %v1236_v55 = vmax.f32 %v1235_v34, 0.0 }
 0x391   : > { %v1232_v37 = vpop.f32.mrf.mxu1  ;;  %v1596_v44 = vpop.f32.mrf.mxu0 }
 0x392   : > { %v1238_v38 = vsub.f32 0.0, %v1237_v36  ;;  %1129 = vst.msk [vmem:[#allocation5] sm:$0x3] %vm1128_vm4, %v1127_v43 }
 0x393   : > { %v1617_v39 = vpop.f32.mrf.mxu1  ;;  %v1124_v45 = vpop.f32.mrf.mxu0 }
 0x394   : > { %v1239_v41 = vmul.f32 1.442695, %v1238_v38 }
 0x395   : > { %v1597_v46 = vpop.f32.mrf.mxu0 }
 0x396   : > { %1702 = vpow2.f32 %v1239_v41 }
 0x3a3   : > { %v1703_v47 = vpop.eup %1702 }
 0x3a4   : > { %v1241_v48 = vadd.f32 1.0, %v1703_v47  ;;  %v1244_v49 = vmul.f32 -0.5, %v1703_v47  ;;  %v1247_v51 = vand.u32 2147483647, %v1703_v47 }
 0x3a6   : > { %1704 = vlog2.f32 %v1241_v48  ;;  %v1245_v50 = vadd.f32 1.0, %v1244_v49  ;;  %vm1248_vm5 = vcmp.lt.f32.partialorder %v1247_v51, 0.0004427343 }
 0x3a8   : > { %v1246_v54 = vmul.f32 %v1703_v47, %v1245_v50 }
 0x3b3   : > { %v1705_v52 = vpop.eup %1704 }
 0x3b4   : > { %v1243_v53 = vmul.f32 0.6931472, %v1705_v52 }
 0x3b6   : > { %v1249_v56 = vsel %vm1248_vm5, %v1246_v54, %v1243_v53 }
 0x3b7   : > { %v1250_v57 = vadd.f32 %v1249_v56, %v1236_v55 }
 0x3b9   : > { %v1251_v58 = vadd.f32 0.001, %v1250_v57 }
 0x3bb   : > { %1252 = vst.msk [vmem:[#allocation7] sm:$0x3] %vm1128_vm4, %v1251_v58 }
 0x3bc PF: > { %p1626_p6 = scmp.eq.s32.totalorder %s1859_s30, 7  ;;  %s1776_s22 = smov [#allocation5]  }
 0x3bd   : > { %s1260_s23 = sshll.u32 %s1776_s22, 4  ;;  %s1777_s24 = smov [#allocation7]   ;;  %s1261_s23 = int_to_ptr.vmem [resolvable:$true] %s1260_s23 }
 0x3be   : > { %s1271_s25 = sshll.u32 %s1777_s24, 4  ;;  %s1706_s26 = scalar_lea.vmem %s1261_s23, 32  ;;  %s1272_s25 = int_to_ptr.vmem [resolvable:$true] %s1271_s25 }
 0x3bf   : > { %p1707_p7 = scmp.ne.s32.totalorder %s1261_s23, %s1706_s26  ;;  %p1713_p10 = scmp.lt.s32.totalorder %s1261_s23, %s1261_s23 }
 0x3c0   : > { %p1714_p11 = scmp.lt.s32.totalorder %s1706_s26, %s1706_s26 }
 0x3c1   : > { %p1708_p8 = pnand %p1707_p7, %p1626_p6 }
 0x3c2   : > { %p1715_p12 = por %p1714_p11, %p1713_p10 }
 0x3c3   : > { %p1709_p9 = pneg %p1708_p8 }
 0x3c5   : > { %p1716_p13 = pnand %p1715_p12, %p1709_p9 }
 0x3c7   : > { %1719 = shalt.err (!%p1716_p13)
}
 0x3c8   : > { %1619 = dma.vmem_to_hbm [thread:$0]  (%p1626_p6), %s1261_s23, 32, %s2138_s13, [#allocation6]  }
 0x3c9   : > { %s1730_s15 = scalar_lea.vmem %s1272_s25, 32  ;;  %p1737_p3 = scmp.lt.s32.totalorder %s1272_s25, %s1272_s25 }
 0x3ca   : > { %p1731_p0 = scmp.ne.s32.totalorder %s1272_s25, %s1730_s15  ;;  %p1738_p4 = scmp.lt.s32.totalorder %s1730_s15, %s1730_s15 }
 0x3cc   : > { %p1732_p1 = pnand %p1731_p0, %p1626_p6  ;;  %p1739_p5 = por %p1738_p4, %p1737_p3 }
 0x3ce   : > { %p1733_p2 = pneg %p1732_p1 }
 0x3d0   : > { %p1740_p7 = pnand %p1739_p5, %p1733_p2 }
 0x3d2   : > { %1743 = shalt.err (!%p1740_p7)
}
 0x3d3   : > { %1621 = dma.vmem_to_hbm [thread:$0]  (%p1626_p6), %s1272_s25, 32, %s2139_s14, [#allocation8]  }
 0x3d4   : > { %1759 = dma.done.wait (%p1626_p6), [#allocation6], 32  }
 0x3d5   : > { %1761 = vsyncadd (%p1626_p6), [#allocation6], 4294967264 }
 0x3d6   : > { %1763 = dma.done.wait (%p1626_p6), [#allocation8], 32  }
 0x3d7   : > { %1765 = vsyncadd (%p1626_p6), [#allocation8], 4294967264 }
 0x3d8 PF: > { %s27_s29 = sadd.s32 1, %s1768_s29  }
 0x3d9   : > { %p24_p8 = scmp.ge.s32.totalorder %s27_s29, 10  }
 0x3db   :  { %26 = sbr.rel (!%p24_p8) target bundleno = 2 (0x2), region = 121 }
 0x3e0   :  { %1288 = vsyncpa [#allocation6], 1 }
 0x3e1   :  { %1290 = vsyncpa [#allocation6 + $0x1], 1 }
 0x3e2   :  { %1291 = vsyncpa [#allocation8], 1 }

</bundles_post_ra>
